<compile_context>
chip_gen: v6e
topology: v6e:2x2x1
jax: 0.10.0
libtpu: 0.0.40
codegen_flags: <defaults>
</compile_context>

<pallas_src>
import functools
import math

import jax
import jax.numpy as jnp
from jax.experimental import pallas as pl
from jax.experimental.pallas import tpu as pltpu

# ----------------------------- model config ---------------------------------
B, S = 2, 8                      # batch, sequence length
INPUT_SIZE = 16
HIDDEN = 32
NUM_LAYERS = 2
NUM_HEADS = 4
NUM_CLASSES = 5
LN_EPS = 1e-5
HEAD_DIM = HIDDEN // NUM_HEADS
LANE = 128
SUBLANE = 8


# ----------------------------- shared math -----------------------------------
def _layernorm(x, gamma, beta, eps=LN_EPS):
    mu = jnp.mean(x, axis=-1, keepdims=True)
    var = jnp.mean((x - mu) ** 2, axis=-1, keepdims=True)
    return (x - mu) * jax.lax.rsqrt(var + eps) * gamma + beta


def _bdot(a, b):
    """MXU matmul: bf16 operands, f32 accumulation."""
    return jnp.dot(a.astype(jnp.bfloat16), b.astype(jnp.bfloat16),
                   preferred_element_type=jnp.float32)


# ----------------------------- fused Pallas kernel ----------------------------
def fused_forward_kernel(x_ref, p_ref, o_ref, *, layout, num_layers,
                         num_heads, seq_len, batch):
    """Entire forward pass, fully VMEM-resident, no grid.

    x_ref : (B*S, INPUT_SIZE) f32
    p_ref : (rows, 128) f32 packed parameter buffer (see pack_params)
    o_ref : (B, 128) f32 lane-dense classifier output (cols >= NUM_CLASSES == 0)
    """
    def get(name):                               # exact (rows, cols) view
        off, r, c = layout[name]
        return p_ref[off:off + r, :c]

    def get_full(name):                          # full 128-lane (zero-padded) view
        off, r, _ = layout[name]
        return p_ref[off:off + r, :]

    bf16 = jnp.bfloat16
    Bn, Sn, NH = batch, seq_len, num_heads
    H = HIDDEN
    dh = H // NH
    scale = 1.0 / math.sqrt(dh)

    x = x_ref[...]                                                 # (B*S, I)

    # ---- input projection (dropout = identity in eval mode) ------------------
    h = _bdot(x, get("w_in")) + get("b_in")                        # (B*S, H) f32

    # ---- transformer encoder stack (post-norm, ReLU FFN) ---------------------
    for l in range(num_layers):
        # fused QKV: single (B*S,H)@(H,3H) MXU matmul + lane-dense bias
        qkv = _bdot(h, get(f"l{l}_wqkv")) + get(f"l{l}_bqkv")      # (B*S, 3H)
        q = qkv[:, 0 * H:1 * H]
        k = qkv[:, 1 * H:2 * H]
        v = qkv[:, 2 * H:3 * H]

        # fold batch into the head batch dim -> (B*NH, S, dh)
        def heads(t):
            return jnp.concatenate(
                [t[b * Sn:(b + 1) * Sn, hd * dh:(hd + 1) * dh][None]
                 for b in range(Bn) for hd in range(NH)], axis=0)

        qh = heads(q).astype(bf16)
        kh = heads(k).astype(bf16)
        vh = heads(v).astype(bf16)

        # scores / softmax / context as single batched einsums on (B*NH,S,dh)
        s = jnp.einsum("nqd,nkd->nqk", qh, kh,
                       preferred_element_type=jnp.float32) * scale
        s = s - jnp.max(s, axis=-1, keepdims=True)
        p = jnp.exp(s)
        p = p / jnp.sum(p, axis=-1, keepdims=True)                 # exact softmax
        ctx = jnp.einsum("nqk,nkd->nqd", p.astype(bf16), vh,
                         preferred_element_type=jnp.float32)       # (B*NH, S, dh)

        # concat heads back to (B*S, H); single out-projection matmul
        ctx_flat = jnp.concatenate(
            [jnp.concatenate([ctx[b * NH + hd] for hd in range(NH)], axis=-1)
             for b in range(Bn)], axis=0)                          # (B*S, H)
        attn = _bdot(ctx_flat, get(f"l{l}_wo")) + get(f"l{l}_bo")

        h = _layernorm(h + attn, get(f"l{l}_g1"), get(f"l{l}_be1"))

        f = _bdot(h, get(f"l{l}_w1")) + get(f"l{l}_b1")
        f = jnp.maximum(f, 0.0)
        f = _bdot(f, get(f"l{l}_w2")) + get(f"l{l}_b2")

        h = _layernorm(h + f, get(f"l{l}_g2"), get(f"l{l}_be2"))

    # ---- mean pool over sequence + classifier head ---------------------------
    pooled = jnp.concatenate(
        [jnp.mean(h[b * Sn:(b + 1) * Sn, :], axis=0, keepdims=True)
         for b in range(Bn)], axis=0)                              # (B, H)

    # lane-dense (B, 128) store; padded fc weight/bias columns are zero
    o_ref[...] = _bdot(pooled, get_full("fc_w")) + get_full("fc_b")


# ----------------------------- wrapper ----------------------------------------
def forward(x, packed, layout):
    """Single fused, grid-free pallas_call for the whole forward pass."""
    bsz, seq, _ = x.shape
    x2d = jnp.reshape(x, (bsz * seq, x.shape[2]))          # reshape outside kernel

    kern = functools.partial(fused_forward_kernel, layout=layout,
                             num_layers=NUM_LAYERS, num_heads=NUM_HEADS,
                             seq_len=seq, batch=bsz)

    bs = bsz * seq
    per_layer = (2 * bs * HIDDEN * 3 * HIDDEN                       # qkv proj
                 + 2 * (bsz * NUM_HEADS) * seq * seq * HEAD_DIM * 2  # scores+ctx
                 + 2 * bs * HIDDEN * HIDDEN                          # out proj
                 + 2 * bs * HIDDEN * (2 * HIDDEN) * 2)               # FFN
    flops = (2 * bs * INPUT_SIZE * HIDDEN
             + NUM_LAYERS * per_layer
             + 2 * bsz * HIDDEN * LANE)
    transcendentals = NUM_LAYERS * bsz * NUM_HEADS * seq * seq       # exp
    bytes_accessed = (x2d.size + packed.size + bsz * LANE) * 4
    cost = pl.CostEstimate(flops=flops, transcendentals=transcendentals,
                           bytes_accessed=bytes_accessed)

    vmem = pl.BlockSpec(memory_space=pltpu.MemorySpace.VMEM)
    out_padded = pl.pallas_call(
        kern,
        out_shape=jax.ShapeDtypeStruct((bsz, LANE), jnp.float32),
        in_specs=[vmem, vmem],
        out_specs=vmem,
        cost_estimate=cost,
    )(x2d, packed)
    return out_padded[:, :NUM_CLASSES]


# ----------------------------- parameters ------------------------------------
def init_linear(key, out_f, in_f):
    """PyTorch-style nn.Linear init: W (out,in), b (out,)."""
    k1, k2 = jax.random.split(key)
    bound = 1.0 / math.sqrt(in_f)
    w = jax.random.uniform(k1, (out_f, in_f), jnp.float32, -bound, bound)
    b = jax.random.uniform(k2, (out_f,), jnp.float32, -bound, bound)
    return w, b


def init_params(key):
    keys = jax.random.split(key, 2 + NUM_LAYERS)
    in_w, in_b = init_linear(keys[0], HIDDEN, INPUT_SIZE)
    fc_w, fc_b = init_linear(keys[1], NUM_CLASSES, HIDDEN)
    layers = []
    for l in range(NUM_LAYERS):
        lk = jax.random.split(keys[2 + l], 4)
        wqkv, bqkv = init_linear(lk[0], 3 * HIDDEN, HIDDEN)
        wo, bo = init_linear(lk[1], HIDDEN, HIDDEN)
        w1, b1 = init_linear(lk[2], 2 * HIDDEN, HIDDEN)
        w2, b2 = init_linear(lk[3], HIDDEN, 2 * HIDDEN)
        layers.append(dict(
            wqkv=wqkv, bqkv=bqkv, wo=wo, bo=bo,
            w1=w1, b1=b1, w2=w2, b2=b2,
            g1=jnp.ones((HIDDEN,), jnp.float32),
            be1=jnp.zeros((HIDDEN,), jnp.float32),
            g2=jnp.ones((HIDDEN,), jnp.float32),
            be2=jnp.zeros((HIDDEN,), jnp.float32)))
    return dict(in_w=in_w, in_b=in_b, fc_w=fc_w, fc_b=fc_b, layers=layers)


def pack_params(params):
    """PyTorch-layout params -> ONE tile-aligned (rows, 128) f32 buffer.

    Every parameter is pre-transposed to (in_features, out_features), padded
    to a multiple of 8 rows and 128 lanes, and stacked along rows so the whole
    parameter set is a single HBM->VMEM DMA.  `layout[name]` holds the static
    (row_offset, rows, cols) used for zero-cost ref slicing in the kernel.
    """
    entries = [("w_in", params["in_w"].T), ("b_in", params["in_b"][None, :])]
    for l, lp in enumerate(params["layers"]):
        entries += [
            (f"l{l}_wqkv", lp["wqkv"].T), (f"l{l}_bqkv", lp["bqkv"][None, :]),
            (f"l{l}_wo",   lp["wo"].T),   (f"l{l}_bo",   lp["bo"][None, :]),
            (f"l{l}_g1",   lp["g1"][None, :]), (f"l{l}_be1", lp["be1"][None, :]),
            (f"l{l}_w1",   lp["w1"].T),   (f"l{l}_b1",   lp["b1"][None, :]),
            (f"l{l}_w2",   lp["w2"].T),   (f"l{l}_b2",   lp["b2"][None, :]),
            (f"l{l}_g2",   lp["g2"][None, :]), (f"l{l}_be2", lp["be2"][None, :]),
        ]
    entries += [("fc_w", params["fc_w"].T), ("fc_b", params["fc_b"][None, :])]

    layout, blocks, off = {}, [], 0
    for name, a in entries:
        a = jnp.asarray(a, jnp.float32)
        r, c = a.shape
        assert c <= LANE, name
        rp = -(-r // SUBLANE) * SUBLANE
        blk = jnp.zeros((rp, LANE), jnp.float32).at[:r, :c].set(a)
        layout[name] = (off, r, c)
        blocks.append(blk)
        off += rp
    return jnp.concatenate(blocks, axis=0), layout


# ----------------------------- pure-JAX reference ----------------------------
def ref_forward(x, params):
    h = x @ params["in_w"].T + params["in_b"]
    dh = HEAD_DIM
    for lp in params["layers"]:
        qkv = h @ lp["wqkv"].T + lp["bqkv"]
        q, k, v = jnp.split(qkv, 3, axis=-1)
        q = q.reshape(B, S, NUM_HEADS, dh).transpose(0, 2, 1, 3)
        k = k.reshape(B, S, NUM_HEADS, dh).transpose(0, 2, 1, 3)
        v = v.reshape(B, S, NUM_HEADS, dh).transpose(0, 2, 1, 3)
        scores = jnp.einsum("bhqd,bhkd->bhqk", q, k) / math.sqrt(dh)
        p = jax.nn.softmax(scores, axis=-1)
        a = jnp.einsum("bhqk,bhkd->bhqd", p, v)
        a = a.transpose(0, 2, 1, 3).reshape(B, S, HIDDEN)
        a = a @ lp["wo"].T + lp["bo"]
        h = _layernorm(h + a, lp["g1"], lp["be1"])
        f = jnp.maximum(h @ lp["w1"].T + lp["b1"], 0.0)
        f = f @ lp["w2"].T + lp["b2"]
        h = _layernorm(h + f, lp["g2"], lp["be2"])
    pooled = jnp.mean(h, axis=1)
    return pooled @ params["fc_w"].T + params["fc_b"]


# ----------------------------- main -------------------------------------------
if __name__ == "__main__":
    key = jax.random.PRNGKey(0)
    pkey, xkey = jax.random.split(key)
    params = init_params(pkey)
    packed, layout = pack_params(params)
    x = jax.random.normal(xkey, (B, S, INPUT_SIZE), jnp.float32)

    out = forward(x, packed, layout)
    jax.block_until_ready(out)

    ref = ref_forward(x, params)
    assert out.shape == (B, NUM_CLASSES)
    # tolerance covers bf16 MXU operands (f32 accumulation) vs the f32 reference
    max_diff = float(jnp.max(jnp.abs(out - ref)))
    assert jnp.allclose(out, ref, atol=2e-2, rtol=2e-2), \
        f"Pallas/ref mismatch: max abs diff = {max_diff}"

    print("KERNEL_OK")
</pallas_src>

<mosaic_0001>
module attributes {stable_mosaic.version = 11 : i64} {
  func.func @fused_forward_kernel(%arg0: memref<16x16xf32, #tpu.memory_space<vmem>>, %arg1: memref<512x128xf32, #tpu.memory_space<vmem>>, %arg2: memref<2x128xf32, #tpu.memory_space<vmem>>) attributes {dimension_semantics = [], scalar_prefetch = 0 : i64, scratch_operands = 0 : i64, tpu.core_type = #tpu.core_type<tc>} {
    %c0 = arith.constant 0 : index
    %c0_0 = arith.constant 0 : index
    %0 = vector.load %arg0[%c0, %c0_0] : memref<16x16xf32, #tpu.memory_space<vmem>>, vector<16x16xf32>
    %c0_1 = arith.constant 0 : index
    %c0_2 = arith.constant 0 : index
    %1 = vector.load %arg1[%c0_1, %c0_2] : memref<512x128xf32, #tpu.memory_space<vmem>>, vector<16x32xf32>
    %2 = arith.truncf %0 : vector<16x16xf32> to vector<16x16xbf16>
    %3 = arith.truncf %1 : vector<16x32xf32> to vector<16x32xbf16>
    %cst = arith.constant dense<0.000000e+00> : vector<16x32xf32>
    %4 = tpu.matmul %2, %3, %cst {dimension_numbers = #tpu.dot_dimension_numbers<[1], [0], [0], [1], [0, 0, 1, 1], [], []>} : vector<16x16xbf16>, vector<16x32xbf16>, vector<16x32xf32> -> vector<16x32xf32>
    %c16 = arith.constant 16 : index
    %c0_3 = arith.constant 0 : index
    %5 = vector.load %arg1[%c16, %c0_3] : memref<512x128xf32, #tpu.memory_space<vmem>>, vector<1x32xf32>
    %6 = vector.broadcast %5 : vector<1x32xf32> to vector<16x32xf32>
    %7 = arith.addf %4, %6 : vector<16x32xf32>
    %c24 = arith.constant 24 : index
    %c0_4 = arith.constant 0 : index
    %8 = vector.load %arg1[%c24, %c0_4] : memref<512x128xf32, #tpu.memory_space<vmem>>, vector<32x96xf32>
    %9 = arith.truncf %7 : vector<16x32xf32> to vector<16x32xbf16>
    %10 = arith.truncf %8 : vector<32x96xf32> to vector<32x96xbf16>
    %cst_5 = arith.constant dense<0.000000e+00> : vector<16x96xf32>
    %11 = tpu.matmul %9, %10, %cst_5 {dimension_numbers = #tpu.dot_dimension_numbers<[1], [0], [0], [1], [0, 0, 1, 1], [], []>} : vector<16x32xbf16>, vector<32x96xbf16>, vector<16x96xf32> -> vector<16x96xf32>
    %c56 = arith.constant 56 : index
    %c0_6 = arith.constant 0 : index
    %12 = vector.load %arg1[%c56, %c0_6] : memref<512x128xf32, #tpu.memory_space<vmem>>, vector<1x96xf32>
    %13 = vector.broadcast %12 : vector<1x96xf32> to vector<16x96xf32>
    %14 = arith.addf %11, %13 : vector<16x96xf32>
    %15 = vector.extract_strided_slice %14 {offsets = [0, 0], sizes = [16, 32], strides = [1, 1]} : vector<16x96xf32> to vector<16x32xf32>
    %16 = vector.extract_strided_slice %14 {offsets = [0, 32], sizes = [16, 32], strides = [1, 1]} : vector<16x96xf32> to vector<16x32xf32>
    %17 = vector.extract_strided_slice %14 {offsets = [0, 64], sizes = [16, 32], strides = [1, 1]} : vector<16x96xf32> to vector<16x32xf32>
    %18 = vector.extract_strided_slice %15 {offsets = [0, 0], sizes = [8, 8], strides = [1, 1]} : vector<16x32xf32> to vector<8x8xf32>
    %19 = vector.shape_cast %18 : vector<8x8xf32> to vector<1x8x8xf32>
    %20 = vector.extract_strided_slice %15 {offsets = [0, 8], sizes = [8, 8], strides = [1, 1]} : vector<16x32xf32> to vector<8x8xf32>
    %21 = vector.shape_cast %20 : vector<8x8xf32> to vector<1x8x8xf32>
    %22 = vector.extract_strided_slice %15 {offsets = [0, 16], sizes = [8, 8], strides = [1, 1]} : vector<16x32xf32> to vector<8x8xf32>
    %23 = vector.shape_cast %22 : vector<8x8xf32> to vector<1x8x8xf32>
    %24 = vector.extract_strided_slice %15 {offsets = [0, 24], sizes = [8, 8], strides = [1, 1]} : vector<16x32xf32> to vector<8x8xf32>
    %25 = vector.shape_cast %24 : vector<8x8xf32> to vector<1x8x8xf32>
    %26 = vector.extract_strided_slice %15 {offsets = [8, 0], sizes = [8, 8], strides = [1, 1]} : vector<16x32xf32> to vector<8x8xf32>
    %27 = vector.shape_cast %26 : vector<8x8xf32> to vector<1x8x8xf32>
    %28 = vector.extract_strided_slice %15 {offsets = [8, 8], sizes = [8, 8], strides = [1, 1]} : vector<16x32xf32> to vector<8x8xf32>
    %29 = vector.shape_cast %28 : vector<8x8xf32> to vector<1x8x8xf32>
    %30 = vector.extract_strided_slice %15 {offsets = [8, 16], sizes = [8, 8], strides = [1, 1]} : vector<16x32xf32> to vector<8x8xf32>
    %31 = vector.shape_cast %30 : vector<8x8xf32> to vector<1x8x8xf32>
    %32 = vector.extract_strided_slice %15 {offsets = [8, 24], sizes = [8, 8], strides = [1, 1]} : vector<16x32xf32> to vector<8x8xf32>
    %33 = vector.shape_cast %32 : vector<8x8xf32> to vector<1x8x8xf32>
    %34 = tpu.concatenate %19, %21, %23, %25, %27, %29, %31, %33 in 0 : vector<1x8x8xf32>, vector<1x8x8xf32>, vector<1x8x8xf32>, vector<1x8x8xf32>, vector<1x8x8xf32>, vector<1x8x8xf32>, vector<1x8x8xf32>, vector<1x8x8xf32> -> vector<8x8x8xf32>
    %35 = arith.truncf %34 : vector<8x8x8xf32> to vector<8x8x8xbf16>
    %36 = vector.extract_strided_slice %16 {offsets = [0, 0], sizes = [8, 8], strides = [1, 1]} : vector<16x32xf32> to vector<8x8xf32>
    %37 = vector.shape_cast %36 : vector<8x8xf32> to vector<1x8x8xf32>
    %38 = vector.extract_strided_slice %16 {offsets = [0, 8], sizes = [8, 8], strides = [1, 1]} : vector<16x32xf32> to vector<8x8xf32>
    %39 = vector.shape_cast %38 : vector<8x8xf32> to vector<1x8x8xf32>
    %40 = vector.extract_strided_slice %16 {offsets = [0, 16], sizes = [8, 8], strides = [1, 1]} : vector<16x32xf32> to vector<8x8xf32>
    %41 = vector.shape_cast %40 : vector<8x8xf32> to vector<1x8x8xf32>
    %42 = vector.extract_strided_slice %16 {offsets = [0, 24], sizes = [8, 8], strides = [1, 1]} : vector<16x32xf32> to vector<8x8xf32>
    %43 = vector.shape_cast %42 : vector<8x8xf32> to vector<1x8x8xf32>
    %44 = vector.extract_strided_slice %16 {offsets = [8, 0], sizes = [8, 8], strides = [1, 1]} : vector<16x32xf32> to vector<8x8xf32>
    %45 = vector.shape_cast %44 : vector<8x8xf32> to vector<1x8x8xf32>
    %46 = vector.extract_strided_slice %16 {offsets = [8, 8], sizes = [8, 8], strides = [1, 1]} : vector<16x32xf32> to vector<8x8xf32>
    %47 = vector.shape_cast %46 : vector<8x8xf32> to vector<1x8x8xf32>
    %48 = vector.extract_strided_slice %16 {offsets = [8, 16], sizes = [8, 8], strides = [1, 1]} : vector<16x32xf32> to vector<8x8xf32>
    %49 = vector.shape_cast %48 : vector<8x8xf32> to vector<1x8x8xf32>
    %50 = vector.extract_strided_slice %16 {offsets = [8, 24], sizes = [8, 8], strides = [1, 1]} : vector<16x32xf32> to vector<8x8xf32>
    %51 = vector.shape_cast %50 : vector<8x8xf32> to vector<1x8x8xf32>
    %52 = tpu.concatenate %37, %39, %41, %43, %45, %47, %49, %51 in 0 : vector<1x8x8xf32>, vector<1x8x8xf32>, vector<1x8x8xf32>, vector<1x8x8xf32>, vector<1x8x8xf32>, vector<1x8x8xf32>, vector<1x8x8xf32>, vector<1x8x8xf32> -> vector<8x8x8xf32>
    %53 = arith.truncf %52 : vector<8x8x8xf32> to vector<8x8x8xbf16>
    %54 = vector.extract_strided_slice %17 {offsets = [0, 0], sizes = [8, 8], strides = [1, 1]} : vector<16x32xf32> to vector<8x8xf32>
    %55 = vector.shape_cast %54 : vector<8x8xf32> to vector<1x8x8xf32>
    %56 = vector.extract_strided_slice %17 {offsets = [0, 8], sizes = [8, 8], strides = [1, 1]} : vector<16x32xf32> to vector<8x8xf32>
    %57 = vector.shape_cast %56 : vector<8x8xf32> to vector<1x8x8xf32>
    %58 = vector.extract_strided_slice %17 {offsets = [0, 16], sizes = [8, 8], strides = [1, 1]} : vector<16x32xf32> to vector<8x8xf32>
    %59 = vector.shape_cast %58 : vector<8x8xf32> to vector<1x8x8xf32>
    %60 = vector.extract_strided_slice %17 {offsets = [0, 24], sizes = [8, 8], strides = [1, 1]} : vector<16x32xf32> to vector<8x8xf32>
    %61 = vector.shape_cast %60 : vector<8x8xf32> to vector<1x8x8xf32>
    %62 = vector.extract_strided_slice %17 {offsets = [8, 0], sizes = [8, 8], strides = [1, 1]} : vector<16x32xf32> to vector<8x8xf32>
    %63 = vector.shape_cast %62 : vector<8x8xf32> to vector<1x8x8xf32>
    %64 = vector.extract_strided_slice %17 {offsets = [8, 8], sizes = [8, 8], strides = [1, 1]} : vector<16x32xf32> to vector<8x8xf32>
    %65 = vector.shape_cast %64 : vector<8x8xf32> to vector<1x8x8xf32>
    %66 = vector.extract_strided_slice %17 {offsets = [8, 16], sizes = [8, 8], strides = [1, 1]} : vector<16x32xf32> to vector<8x8xf32>
    %67 = vector.shape_cast %66 : vector<8x8xf32> to vector<1x8x8xf32>
    %68 = vector.extract_strided_slice %17 {offsets = [8, 24], sizes = [8, 8], strides = [1, 1]} : vector<16x32xf32> to vector<8x8xf32>
    %69 = vector.shape_cast %68 : vector<8x8xf32> to vector<1x8x8xf32>
    %70 = tpu.concatenate %55, %57, %59, %61, %63, %65, %67, %69 in 0 : vector<1x8x8xf32>, vector<1x8x8xf32>, vector<1x8x8xf32>, vector<1x8x8xf32>, vector<1x8x8xf32>, vector<1x8x8xf32>, vector<1x8x8xf32>, vector<1x8x8xf32> -> vector<8x8x8xf32>
    %71 = arith.truncf %70 : vector<8x8x8xf32> to vector<8x8x8xbf16>
    "tpu.trace_start"() <{level = 10 : i32, message = "nqd,nkd->nqk"}> : () -> ()
    %cst_7 = arith.constant dense<0.000000e+00> : vector<8x8x8xf32>
    %72 = tpu.matmul %35, %53, %cst_7 {dimension_numbers = #tpu.dot_dimension_numbers<[2], [2], [1], [1], [0, 0, 0, 1, 1, 1], [0], [0]>} : vector<8x8x8xbf16>, vector<8x8x8xbf16>, vector<8x8x8xf32> -> vector<8x8x8xf32>
    "tpu.trace_stop"() : () -> ()
    %cst_8 = arith.constant 0.353553385 : f32
    %73 = vector.broadcast %cst_8 : f32 to vector<8x8x8xf32>
    %74 = arith.mulf %72, %73 : vector<8x8x8xf32>
    %cst_9 = arith.constant dense<0xFF800000> : vector<8x8xf32>
    %75 = vector.multi_reduction <maximumf>, %74, %cst_9 [2] : vector<8x8x8xf32> to vector<8x8xf32>
    %76 = vector.shape_cast %75 : vector<8x8xf32> to vector<8x8x1xf32>
    %77 = vector.broadcast %76 : vector<8x8x1xf32> to vector<8x8x8xf32>
    %78 = arith.subf %74, %77 : vector<8x8x8xf32>
    %79 = math.exp %78 : vector<8x8x8xf32>
    %cst_10 = arith.constant dense<0.000000e+00> : vector<8x8xf32>
    %80 = vector.multi_reduction <add>, %79, %cst_10 [2] : vector<8x8x8xf32> to vector<8x8xf32>
    %81 = vector.shape_cast %80 : vector<8x8xf32> to vector<8x8x1xf32>
    %82 = vector.broadcast %81 : vector<8x8x1xf32> to vector<8x8x8xf32>
    %83 = arith.divf %79, %82 : vector<8x8x8xf32>
    %84 = arith.truncf %83 : vector<8x8x8xf32> to vector<8x8x8xbf16>
    "tpu.trace_start"() <{level = 10 : i32, message = "nqk,nkd->nqd"}> : () -> ()
    %cst_11 = arith.constant dense<0.000000e+00> : vector<8x8x8xf32>
    %85 = tpu.matmul %84, %71, %cst_11 {dimension_numbers = #tpu.dot_dimension_numbers<[2], [1], [1], [2], [0, 0, 0, 1, 1, 2], [0], [0]>} : vector<8x8x8xbf16>, vector<8x8x8xbf16>, vector<8x8x8xf32> -> vector<8x8x8xf32>
    "tpu.trace_stop"() : () -> ()
    %86 = vector.extract_strided_slice %85 {offsets = [0, 0, 0], sizes = [1, 8, 8], strides = [1, 1, 1]} : vector<8x8x8xf32> to vector<1x8x8xf32>
    %87 = vector.shape_cast %86 : vector<1x8x8xf32> to vector<8x8xf32>
    %88 = vector.extract_strided_slice %85 {offsets = [1, 0, 0], sizes = [1, 8, 8], strides = [1, 1, 1]} : vector<8x8x8xf32> to vector<1x8x8xf32>
    %89 = vector.shape_cast %88 : vector<1x8x8xf32> to vector<8x8xf32>
    %90 = vector.extract_strided_slice %85 {offsets = [2, 0, 0], sizes = [1, 8, 8], strides = [1, 1, 1]} : vector<8x8x8xf32> to vector<1x8x8xf32>
    %91 = vector.shape_cast %90 : vector<1x8x8xf32> to vector<8x8xf32>
    %92 = vector.extract_strided_slice %85 {offsets = [3, 0, 0], sizes = [1, 8, 8], strides = [1, 1, 1]} : vector<8x8x8xf32> to vector<1x8x8xf32>
    %93 = vector.shape_cast %92 : vector<1x8x8xf32> to vector<8x8xf32>
    %94 = tpu.concatenate %87, %89, %91, %93 in 1 : vector<8x8xf32>, vector<8x8xf32>, vector<8x8xf32>, vector<8x8xf32> -> vector<8x32xf32>
    %95 = vector.extract_strided_slice %85 {offsets = [4, 0, 0], sizes = [1, 8, 8], strides = [1, 1, 1]} : vector<8x8x8xf32> to vector<1x8x8xf32>
    %96 = vector.shape_cast %95 : vector<1x8x8xf32> to vector<8x8xf32>
    %97 = vector.extract_strided_slice %85 {offsets = [5, 0, 0], sizes = [1, 8, 8], strides = [1, 1, 1]} : vector<8x8x8xf32> to vector<1x8x8xf32>
    %98 = vector.shape_cast %97 : vector<1x8x8xf32> to vector<8x8xf32>
    %99 = vector.extract_strided_slice %85 {offsets = [6, 0, 0], sizes = [1, 8, 8], strides = [1, 1, 1]} : vector<8x8x8xf32> to vector<1x8x8xf32>
    %100 = vector.shape_cast %99 : vector<1x8x8xf32> to vector<8x8xf32>
    %101 = vector.extract_strided_slice %85 {offsets = [7, 0, 0], sizes = [1, 8, 8], strides = [1, 1, 1]} : vector<8x8x8xf32> to vector<1x8x8xf32>
    %102 = vector.shape_cast %101 : vector<1x8x8xf32> to vector<8x8xf32>
    %103 = tpu.concatenate %96, %98, %100, %102 in 1 : vector<8x8xf32>, vector<8x8xf32>, vector<8x8xf32>, vector<8x8xf32> -> vector<8x32xf32>
    %104 = tpu.concatenate %94, %103 in 0 : vector<8x32xf32>, vector<8x32xf32> -> vector<16x32xf32>
    %c64 = arith.constant 64 : index
    %c0_12 = arith.constant 0 : index
    %105 = vector.load %arg1[%c64, %c0_12] : memref<512x128xf32, #tpu.memory_space<vmem>>, vector<32x32xf32>
    %106 = arith.truncf %104 : vector<16x32xf32> to vector<16x32xbf16>
    %107 = arith.truncf %105 : vector<32x32xf32> to vector<32x32xbf16>
    %cst_13 = arith.constant dense<0.000000e+00> : vector<16x32xf32>
    %108 = tpu.matmul %106, %107, %cst_13 {dimension_numbers = #tpu.dot_dimension_numbers<[1], [0], [0], [1], [0, 0, 1, 1], [], []>} : vector<16x32xbf16>, vector<32x32xbf16>, vector<16x32xf32> -> vector<16x32xf32>
    %c96 = arith.constant 96 : index
    %c0_14 = arith.constant 0 : index
    %109 = vector.load %arg1[%c96, %c0_14] : memref<512x128xf32, #tpu.memory_space<vmem>>, vector<1x32xf32>
    %110 = vector.broadcast %109 : vector<1x32xf32> to vector<16x32xf32>
    %111 = arith.addf %108, %110 : vector<16x32xf32>
    %112 = arith.addf %7, %111 : vector<16x32xf32>
    %c104 = arith.constant 104 : index
    %c0_15 = arith.constant 0 : index
    %113 = vector.load %arg1[%c104, %c0_15] : memref<512x128xf32, #tpu.memory_space<vmem>>, vector<1x32xf32>
    %c112 = arith.constant 112 : index
    %c0_16 = arith.constant 0 : index
    %114 = vector.load %arg1[%c112, %c0_16] : memref<512x128xf32, #tpu.memory_space<vmem>>, vector<1x32xf32>
    %cst_17 = arith.constant dense<0.000000e+00> : vector<16xf32>
    %115 = vector.multi_reduction <add>, %112, %cst_17 [1] : vector<16x32xf32> to vector<16xf32>
    %116 = vector.shape_cast %115 : vector<16xf32> to vector<16x1xf32>
    %cst_18 = arith.constant 3.200000e+01 : f32
    %117 = vector.broadcast %cst_18 : f32 to vector<16x1xf32>
    %118 = arith.divf %116, %117 : vector<16x1xf32>
    %119 = vector.broadcast %118 : vector<16x1xf32> to vector<16x32xf32>
    %120 = arith.subf %112, %119 : vector<16x32xf32>
    %121 = arith.mulf %120, %120 : vector<16x32xf32>
    %cst_19 = arith.constant dense<0.000000e+00> : vector<16xf32>
    %122 = vector.multi_reduction <add>, %121, %cst_19 [1] : vector<16x32xf32> to vector<16xf32>
    %123 = vector.shape_cast %122 : vector<16xf32> to vector<16x1xf32>
    %cst_20 = arith.constant 3.200000e+01 : f32
    %124 = vector.broadcast %cst_20 : f32 to vector<16x1xf32>
    %125 = arith.divf %123, %124 : vector<16x1xf32>
    %126 = vector.broadcast %118 : vector<16x1xf32> to vector<16x32xf32>
    %127 = arith.subf %112, %126 : vector<16x32xf32>
    %cst_21 = arith.constant 9.99999974E-6 : f32
    %128 = vector.broadcast %cst_21 : f32 to vector<16x1xf32>
    %129 = arith.addf %125, %128 : vector<16x1xf32>
    %130 = math.rsqrt %129 : vector<16x1xf32>
    %131 = vector.broadcast %130 : vector<16x1xf32> to vector<16x32xf32>
    %132 = arith.mulf %127, %131 : vector<16x32xf32>
    %133 = vector.broadcast %113 : vector<1x32xf32> to vector<16x32xf32>
    %134 = arith.mulf %132, %133 : vector<16x32xf32>
    %135 = vector.broadcast %114 : vector<1x32xf32> to vector<16x32xf32>
    %136 = arith.addf %134, %135 : vector<16x32xf32>
    %c120 = arith.constant 120 : index
    %c0_22 = arith.constant 0 : index
    %137 = vector.load %arg1[%c120, %c0_22] : memref<512x128xf32, #tpu.memory_space<vmem>>, vector<32x64xf32>
    %138 = arith.truncf %136 : vector<16x32xf32> to vector<16x32xbf16>
    %139 = arith.truncf %137 : vector<32x64xf32> to vector<32x64xbf16>
    %cst_23 = arith.constant dense<0.000000e+00> : vector<16x64xf32>
    %140 = tpu.matmul %138, %139, %cst_23 {dimension_numbers = #tpu.dot_dimension_numbers<[1], [0], [0], [1], [0, 0, 1, 1], [], []>} : vector<16x32xbf16>, vector<32x64xbf16>, vector<16x64xf32> -> vector<16x64xf32>
    %c152 = arith.constant 152 : index
    %c0_24 = arith.constant 0 : index
    %141 = vector.load %arg1[%c152, %c0_24] : memref<512x128xf32, #tpu.memory_space<vmem>>, vector<1x64xf32>
    %142 = vector.broadcast %141 : vector<1x64xf32> to vector<16x64xf32>
    %143 = arith.addf %140, %142 : vector<16x64xf32>
    %cst_25 = arith.constant 0.000000e+00 : f32
    %144 = vector.broadcast %cst_25 : f32 to vector<16x64xf32>
    %145 = arith.maximumf %143, %144 : vector<16x64xf32>
    %c160 = arith.constant 160 : index
    %c0_26 = arith.constant 0 : index
    %146 = vector.load %arg1[%c160, %c0_26] : memref<512x128xf32, #tpu.memory_space<vmem>>, vector<64x32xf32>
    %147 = arith.truncf %145 : vector<16x64xf32> to vector<16x64xbf16>
    %148 = arith.truncf %146 : vector<64x32xf32> to vector<64x32xbf16>
    %cst_27 = arith.constant dense<0.000000e+00> : vector<16x32xf32>
    %149 = tpu.matmul %147, %148, %cst_27 {dimension_numbers = #tpu.dot_dimension_numbers<[1], [0], [0], [1], [0, 0, 1, 1], [], []>} : vector<16x64xbf16>, vector<64x32xbf16>, vector<16x32xf32> -> vector<16x32xf32>
    %c224 = arith.constant 224 : index
    %c0_28 = arith.constant 0 : index
    %150 = vector.load %arg1[%c224, %c0_28] : memref<512x128xf32, #tpu.memory_space<vmem>>, vector<1x32xf32>
    %151 = vector.broadcast %150 : vector<1x32xf32> to vector<16x32xf32>
    %152 = arith.addf %149, %151 : vector<16x32xf32>
    %153 = arith.addf %136, %152 : vector<16x32xf32>
    %c232 = arith.constant 232 : index
    %c0_29 = arith.constant 0 : index
    %154 = vector.load %arg1[%c232, %c0_29] : memref<512x128xf32, #tpu.memory_space<vmem>>, vector<1x32xf32>
    %c240 = arith.constant 240 : index
    %c0_30 = arith.constant 0 : index
    %155 = vector.load %arg1[%c240, %c0_30] : memref<512x128xf32, #tpu.memory_space<vmem>>, vector<1x32xf32>
    %cst_31 = arith.constant dense<0.000000e+00> : vector<16xf32>
    %156 = vector.multi_reduction <add>, %153, %cst_31 [1] : vector<16x32xf32> to vector<16xf32>
    %157 = vector.shape_cast %156 : vector<16xf32> to vector<16x1xf32>
    %cst_32 = arith.constant 3.200000e+01 : f32
    %158 = vector.broadcast %cst_32 : f32 to vector<16x1xf32>
    %159 = arith.divf %157, %158 : vector<16x1xf32>
    %160 = vector.broadcast %159 : vector<16x1xf32> to vector<16x32xf32>
    %161 = arith.subf %153, %160 : vector<16x32xf32>
    %162 = arith.mulf %161, %161 : vector<16x32xf32>
    %cst_33 = arith.constant dense<0.000000e+00> : vector<16xf32>
    %163 = vector.multi_reduction <add>, %162, %cst_33 [1] : vector<16x32xf32> to vector<16xf32>
    %164 = vector.shape_cast %163 : vector<16xf32> to vector<16x1xf32>
    %cst_34 = arith.constant 3.200000e+01 : f32
    %165 = vector.broadcast %cst_34 : f32 to vector<16x1xf32>
    %166 = arith.divf %164, %165 : vector<16x1xf32>
    %167 = vector.broadcast %159 : vector<16x1xf32> to vector<16x32xf32>
    %168 = arith.subf %153, %167 : vector<16x32xf32>
    %cst_35 = arith.constant 9.99999974E-6 : f32
    %169 = vector.broadcast %cst_35 : f32 to vector<16x1xf32>
    %170 = arith.addf %166, %169 : vector<16x1xf32>
    %171 = math.rsqrt %170 : vector<16x1xf32>
    %172 = vector.broadcast %171 : vector<16x1xf32> to vector<16x32xf32>
    %173 = arith.mulf %168, %172 : vector<16x32xf32>
    %174 = vector.broadcast %154 : vector<1x32xf32> to vector<16x32xf32>
    %175 = arith.mulf %173, %174 : vector<16x32xf32>
    %176 = vector.broadcast %155 : vector<1x32xf32> to vector<16x32xf32>
    %177 = arith.addf %175, %176 : vector<16x32xf32>
    %c248 = arith.constant 248 : index
    %c0_36 = arith.constant 0 : index
    %178 = vector.load %arg1[%c248, %c0_36] : memref<512x128xf32, #tpu.memory_space<vmem>>, vector<32x96xf32>
    %179 = arith.truncf %177 : vector<16x32xf32> to vector<16x32xbf16>
    %180 = arith.truncf %178 : vector<32x96xf32> to vector<32x96xbf16>
    %cst_37 = arith.constant dense<0.000000e+00> : vector<16x96xf32>
    %181 = tpu.matmul %179, %180, %cst_37 {dimension_numbers = #tpu.dot_dimension_numbers<[1], [0], [0], [1], [0, 0, 1, 1], [], []>} : vector<16x32xbf16>, vector<32x96xbf16>, vector<16x96xf32> -> vector<16x96xf32>
    %c280 = arith.constant 280 : index
    %c0_38 = arith.constant 0 : index
    %182 = vector.load %arg1[%c280, %c0_38] : memref<512x128xf32, #tpu.memory_space<vmem>>, vector<1x96xf32>
    %183 = vector.broadcast %182 : vector<1x96xf32> to vector<16x96xf32>
    %184 = arith.addf %181, %183 : vector<16x96xf32>
    %185 = vector.extract_strided_slice %184 {offsets = [0, 0], sizes = [16, 32], strides = [1, 1]} : vector<16x96xf32> to vector<16x32xf32>
    %186 = vector.extract_strided_slice %184 {offsets = [0, 32], sizes = [16, 32], strides = [1, 1]} : vector<16x96xf32> to vector<16x32xf32>
    %187 = vector.extract_strided_slice %184 {offsets = [0, 64], sizes = [16, 32], strides = [1, 1]} : vector<16x96xf32> to vector<16x32xf32>
    %188 = vector.extract_strided_slice %185 {offsets = [0, 0], sizes = [8, 8], strides = [1, 1]} : vector<16x32xf32> to vector<8x8xf32>
    %189 = vector.shape_cast %188 : vector<8x8xf32> to vector<1x8x8xf32>
    %190 = vector.extract_strided_slice %185 {offsets = [0, 8], sizes = [8, 8], strides = [1, 1]} : vector<16x32xf32> to vector<8x8xf32>
    %191 = vector.shape_cast %190 : vector<8x8xf32> to vector<1x8x8xf32>
    %192 = vector.extract_strided_slice %185 {offsets = [0, 16], sizes = [8, 8], strides = [1, 1]} : vector<16x32xf32> to vector<8x8xf32>
    %193 = vector.shape_cast %192 : vector<8x8xf32> to vector<1x8x8xf32>
    %194 = vector.extract_strided_slice %185 {offsets = [0, 24], sizes = [8, 8], strides = [1, 1]} : vector<16x32xf32> to vector<8x8xf32>
    %195 = vector.shape_cast %194 : vector<8x8xf32> to vector<1x8x8xf32>
    %196 = vector.extract_strided_slice %185 {offsets = [8, 0], sizes = [8, 8], strides = [1, 1]} : vector<16x32xf32> to vector<8x8xf32>
    %197 = vector.shape_cast %196 : vector<8x8xf32> to vector<1x8x8xf32>
    %198 = vector.extract_strided_slice %185 {offsets = [8, 8], sizes = [8, 8], strides = [1, 1]} : vector<16x32xf32> to vector<8x8xf32>
    %199 = vector.shape_cast %198 : vector<8x8xf32> to vector<1x8x8xf32>
    %200 = vector.extract_strided_slice %185 {offsets = [8, 16], sizes = [8, 8], strides = [1, 1]} : vector<16x32xf32> to vector<8x8xf32>
    %201 = vector.shape_cast %200 : vector<8x8xf32> to vector<1x8x8xf32>
    %202 = vector.extract_strided_slice %185 {offsets = [8, 24], sizes = [8, 8], strides = [1, 1]} : vector<16x32xf32> to vector<8x8xf32>
    %203 = vector.shape_cast %202 : vector<8x8xf32> to vector<1x8x8xf32>
    %204 = tpu.concatenate %189, %191, %193, %195, %197, %199, %201, %203 in 0 : vector<1x8x8xf32>, vector<1x8x8xf32>, vector<1x8x8xf32>, vector<1x8x8xf32>, vector<1x8x8xf32>, vector<1x8x8xf32>, vector<1x8x8xf32>, vector<1x8x8xf32> -> vector<8x8x8xf32>
    %205 = arith.truncf %204 : vector<8x8x8xf32> to vector<8x8x8xbf16>
    %206 = vector.extract_strided_slice %186 {offsets = [0, 0], sizes = [8, 8], strides = [1, 1]} : vector<16x32xf32> to vector<8x8xf32>
    %207 = vector.shape_cast %206 : vector<8x8xf32> to vector<1x8x8xf32>
    %208 = vector.extract_strided_slice %186 {offsets = [0, 8], sizes = [8, 8], strides = [1, 1]} : vector<16x32xf32> to vector<8x8xf32>
    %209 = vector.shape_cast %208 : vector<8x8xf32> to vector<1x8x8xf32>
    %210 = vector.extract_strided_slice %186 {offsets = [0, 16], sizes = [8, 8], strides = [1, 1]} : vector<16x32xf32> to vector<8x8xf32>
    %211 = vector.shape_cast %210 : vector<8x8xf32> to vector<1x8x8xf32>
    %212 = vector.extract_strided_slice %186 {offsets = [0, 24], sizes = [8, 8], strides = [1, 1]} : vector<16x32xf32> to vector<8x8xf32>
    %213 = vector.shape_cast %212 : vector<8x8xf32> to vector<1x8x8xf32>
    %214 = vector.extract_strided_slice %186 {offsets = [8, 0], sizes = [8, 8], strides = [1, 1]} : vector<16x32xf32> to vector<8x8xf32>
    %215 = vector.shape_cast %214 : vector<8x8xf32> to vector<1x8x8xf32>
    %216 = vector.extract_strided_slice %186 {offsets = [8, 8], sizes = [8, 8], strides = [1, 1]} : vector<16x32xf32> to vector<8x8xf32>
    %217 = vector.shape_cast %216 : vector<8x8xf32> to vector<1x8x8xf32>
    %218 = vector.extract_strided_slice %186 {offsets = [8, 16], sizes = [8, 8], strides = [1, 1]} : vector<16x32xf32> to vector<8x8xf32>
    %219 = vector.shape_cast %218 : vector<8x8xf32> to vector<1x8x8xf32>
    %220 = vector.extract_strided_slice %186 {offsets = [8, 24], sizes = [8, 8], strides = [1, 1]} : vector<16x32xf32> to vector<8x8xf32>
    %221 = vector.shape_cast %220 : vector<8x8xf32> to vector<1x8x8xf32>
    %222 = tpu.concatenate %207, %209, %211, %213, %215, %217, %219, %221 in 0 : vector<1x8x8xf32>, vector<1x8x8xf32>, vector<1x8x8xf32>, vector<1x8x8xf32>, vector<1x8x8xf32>, vector<1x8x8xf32>, vector<1x8x8xf32>, vector<1x8x8xf32> -> vector<8x8x8xf32>
    %223 = arith.truncf %222 : vector<8x8x8xf32> to vector<8x8x8xbf16>
    %224 = vector.extract_strided_slice %187 {offsets = [0, 0], sizes = [8, 8], strides = [1, 1]} : vector<16x32xf32> to vector<8x8xf32>
    %225 = vector.shape_cast %224 : vector<8x8xf32> to vector<1x8x8xf32>
    %226 = vector.extract_strided_slice %187 {offsets = [0, 8], sizes = [8, 8], strides = [1, 1]} : vector<16x32xf32> to vector<8x8xf32>
    %227 = vector.shape_cast %226 : vector<8x8xf32> to vector<1x8x8xf32>
    %228 = vector.extract_strided_slice %187 {offsets = [0, 16], sizes = [8, 8], strides = [1, 1]} : vector<16x32xf32> to vector<8x8xf32>
    %229 = vector.shape_cast %228 : vector<8x8xf32> to vector<1x8x8xf32>
    %230 = vector.extract_strided_slice %187 {offsets = [0, 24], sizes = [8, 8], strides = [1, 1]} : vector<16x32xf32> to vector<8x8xf32>
    %231 = vector.shape_cast %230 : vector<8x8xf32> to vector<1x8x8xf32>
    %232 = vector.extract_strided_slice %187 {offsets = [8, 0], sizes = [8, 8], strides = [1, 1]} : vector<16x32xf32> to vector<8x8xf32>
    %233 = vector.shape_cast %232 : vector<8x8xf32> to vector<1x8x8xf32>
    %234 = vector.extract_strided_slice %187 {offsets = [8, 8], sizes = [8, 8], strides = [1, 1]} : vector<16x32xf32> to vector<8x8xf32>
    %235 = vector.shape_cast %234 : vector<8x8xf32> to vector<1x8x8xf32>
    %236 = vector.extract_strided_slice %187 {offsets = [8, 16], sizes = [8, 8], strides = [1, 1]} : vector<16x32xf32> to vector<8x8xf32>
    %237 = vector.shape_cast %236 : vector<8x8xf32> to vector<1x8x8xf32>
    %238 = vector.extract_strided_slice %187 {offsets = [8, 24], sizes = [8, 8], strides = [1, 1]} : vector<16x32xf32> to vector<8x8xf32>
    %239 = vector.shape_cast %238 : vector<8x8xf32> to vector<1x8x8xf32>
    %240 = tpu.concatenate %225, %227, %229, %231, %233, %235, %237, %239 in 0 : vector<1x8x8xf32>, vector<1x8x8xf32>, vector<1x8x8xf32>, vector<1x8x8xf32>, vector<1x8x8xf32>, vector<1x8x8xf32>, vector<1x8x8xf32>, vector<1x8x8xf32> -> vector<8x8x8xf32>
    %241 = arith.truncf %240 : vector<8x8x8xf32> to vector<8x8x8xbf16>
    "tpu.trace_start"() <{level = 10 : i32, message = "nqd,nkd->nqk"}> : () -> ()
    %cst_39 = arith.constant dense<0.000000e+00> : vector<8x8x8xf32>
    %242 = tpu.matmul %205, %223, %cst_39 {dimension_numbers = #tpu.dot_dimension_numbers<[2], [2], [1], [1], [0, 0, 0, 1, 1, 1], [0], [0]>} : vector<8x8x8xbf16>, vector<8x8x8xbf16>, vector<8x8x8xf32> -> vector<8x8x8xf32>
    "tpu.trace_stop"() : () -> ()
    %cst_40 = arith.constant 0.353553385 : f32
    %243 = vector.broadcast %cst_40 : f32 to vector<8x8x8xf32>
    %244 = arith.mulf %242, %243 : vector<8x8x8xf32>
    %cst_41 = arith.constant dense<0xFF800000> : vector<8x8xf32>
    %245 = vector.multi_reduction <maximumf>, %244, %cst_41 [2] : vector<8x8x8xf32> to vector<8x8xf32>
    %246 = vector.shape_cast %245 : vector<8x8xf32> to vector<8x8x1xf32>
    %247 = vector.broadcast %246 : vector<8x8x1xf32> to vector<8x8x8xf32>
    %248 = arith.subf %244, %247 : vector<8x8x8xf32>
    %249 = math.exp %248 : vector<8x8x8xf32>
    %cst_42 = arith.constant dense<0.000000e+00> : vector<8x8xf32>
    %250 = vector.multi_reduction <add>, %249, %cst_42 [2] : vector<8x8x8xf32> to vector<8x8xf32>
    %251 = vector.shape_cast %250 : vector<8x8xf32> to vector<8x8x1xf32>
    %252 = vector.broadcast %251 : vector<8x8x1xf32> to vector<8x8x8xf32>
    %253 = arith.divf %249, %252 : vector<8x8x8xf32>
    %254 = arith.truncf %253 : vector<8x8x8xf32> to vector<8x8x8xbf16>
    "tpu.trace_start"() <{level = 10 : i32, message = "nqk,nkd->nqd"}> : () -> ()
    %cst_43 = arith.constant dense<0.000000e+00> : vector<8x8x8xf32>
    %255 = tpu.matmul %254, %241, %cst_43 {dimension_numbers = #tpu.dot_dimension_numbers<[2], [1], [1], [2], [0, 0, 0, 1, 1, 2], [0], [0]>} : vector<8x8x8xbf16>, vector<8x8x8xbf16>, vector<8x8x8xf32> -> vector<8x8x8xf32>
    "tpu.trace_stop"() : () -> ()
    %256 = vector.extract_strided_slice %255 {offsets = [0, 0, 0], sizes = [1, 8, 8], strides = [1, 1, 1]} : vector<8x8x8xf32> to vector<1x8x8xf32>
    %257 = vector.shape_cast %256 : vector<1x8x8xf32> to vector<8x8xf32>
    %258 = vector.extract_strided_slice %255 {offsets = [1, 0, 0], sizes = [1, 8, 8], strides = [1, 1, 1]} : vector<8x8x8xf32> to vector<1x8x8xf32>
    %259 = vector.shape_cast %258 : vector<1x8x8xf32> to vector<8x8xf32>
    %260 = vector.extract_strided_slice %255 {offsets = [2, 0, 0], sizes = [1, 8, 8], strides = [1, 1, 1]} : vector<8x8x8xf32> to vector<1x8x8xf32>
    %261 = vector.shape_cast %260 : vector<1x8x8xf32> to vector<8x8xf32>
    %262 = vector.extract_strided_slice %255 {offsets = [3, 0, 0], sizes = [1, 8, 8], strides = [1, 1, 1]} : vector<8x8x8xf32> to vector<1x8x8xf32>
    %263 = vector.shape_cast %262 : vector<1x8x8xf32> to vector<8x8xf32>
    %264 = tpu.concatenate %257, %259, %261, %263 in 1 : vector<8x8xf32>, vector<8x8xf32>, vector<8x8xf32>, vector<8x8xf32> -> vector<8x32xf32>
    %265 = vector.extract_strided_slice %255 {offsets = [4, 0, 0], sizes = [1, 8, 8], strides = [1, 1, 1]} : vector<8x8x8xf32> to vector<1x8x8xf32>
    %266 = vector.shape_cast %265 : vector<1x8x8xf32> to vector<8x8xf32>
    %267 = vector.extract_strided_slice %255 {offsets = [5, 0, 0], sizes = [1, 8, 8], strides = [1, 1, 1]} : vector<8x8x8xf32> to vector<1x8x8xf32>
    %268 = vector.shape_cast %267 : vector<1x8x8xf32> to vector<8x8xf32>
    %269 = vector.extract_strided_slice %255 {offsets = [6, 0, 0], sizes = [1, 8, 8], strides = [1, 1, 1]} : vector<8x8x8xf32> to vector<1x8x8xf32>
    %270 = vector.shape_cast %269 : vector<1x8x8xf32> to vector<8x8xf32>
    %271 = vector.extract_strided_slice %255 {offsets = [7, 0, 0], sizes = [1, 8, 8], strides = [1, 1, 1]} : vector<8x8x8xf32> to vector<1x8x8xf32>
    %272 = vector.shape_cast %271 : vector<1x8x8xf32> to vector<8x8xf32>
    %273 = tpu.concatenate %266, %268, %270, %272 in 1 : vector<8x8xf32>, vector<8x8xf32>, vector<8x8xf32>, vector<8x8xf32> -> vector<8x32xf32>
    %274 = tpu.concatenate %264, %273 in 0 : vector<8x32xf32>, vector<8x32xf32> -> vector<16x32xf32>
    %c288 = arith.constant 288 : index
    %c0_44 = arith.constant 0 : index
    %275 = vector.load %arg1[%c288, %c0_44] : memref<512x128xf32, #tpu.memory_space<vmem>>, vector<32x32xf32>
    %276 = arith.truncf %274 : vector<16x32xf32> to vector<16x32xbf16>
    %277 = arith.truncf %275 : vector<32x32xf32> to vector<32x32xbf16>
    %cst_45 = arith.constant dense<0.000000e+00> : vector<16x32xf32>
    %278 = tpu.matmul %276, %277, %cst_45 {dimension_numbers = #tpu.dot_dimension_numbers<[1], [0], [0], [1], [0, 0, 1, 1], [], []>} : vector<16x32xbf16>, vector<32x32xbf16>, vector<16x32xf32> -> vector<16x32xf32>
    %c320 = arith.constant 320 : index
    %c0_46 = arith.constant 0 : index
    %279 = vector.load %arg1[%c320, %c0_46] : memref<512x128xf32, #tpu.memory_space<vmem>>, vector<1x32xf32>
    %280 = vector.broadcast %279 : vector<1x32xf32> to vector<16x32xf32>
    %281 = arith.addf %278, %280 : vector<16x32xf32>
    %282 = arith.addf %177, %281 : vector<16x32xf32>
    %c328 = arith.constant 328 : index
    %c0_47 = arith.constant 0 : index
    %283 = vector.load %arg1[%c328, %c0_47] : memref<512x128xf32, #tpu.memory_space<vmem>>, vector<1x32xf32>
    %c336 = arith.constant 336 : index
    %c0_48 = arith.constant 0 : index
    %284 = vector.load %arg1[%c336, %c0_48] : memref<512x128xf32, #tpu.memory_space<vmem>>, vector<1x32xf32>
    %cst_49 = arith.constant dense<0.000000e+00> : vector<16xf32>
    %285 = vector.multi_reduction <add>, %282, %cst_49 [1] : vector<16x32xf32> to vector<16xf32>
    %286 = vector.shape_cast %285 : vector<16xf32> to vector<16x1xf32>
    %cst_50 = arith.constant 3.200000e+01 : f32
    %287 = vector.broadcast %cst_50 : f32 to vector<16x1xf32>
    %288 = arith.divf %286, %287 : vector<16x1xf32>
    %289 = vector.broadcast %288 : vector<16x1xf32> to vector<16x32xf32>
    %290 = arith.subf %282, %289 : vector<16x32xf32>
    %291 = arith.mulf %290, %290 : vector<16x32xf32>
    %cst_51 = arith.constant dense<0.000000e+00> : vector<16xf32>
    %292 = vector.multi_reduction <add>, %291, %cst_51 [1] : vector<16x32xf32> to vector<16xf32>
    %293 = vector.shape_cast %292 : vector<16xf32> to vector<16x1xf32>
    %cst_52 = arith.constant 3.200000e+01 : f32
    %294 = vector.broadcast %cst_52 : f32 to vector<16x1xf32>
    %295 = arith.divf %293, %294 : vector<16x1xf32>
    %296 = vector.broadcast %288 : vector<16x1xf32> to vector<16x32xf32>
    %297 = arith.subf %282, %296 : vector<16x32xf32>
    %cst_53 = arith.constant 9.99999974E-6 : f32
    %298 = vector.broadcast %cst_53 : f32 to vector<16x1xf32>
    %299 = arith.addf %295, %298 : vector<16x1xf32>
    %300 = math.rsqrt %299 : vector<16x1xf32>
    %301 = vector.broadcast %300 : vector<16x1xf32> to vector<16x32xf32>
    %302 = arith.mulf %297, %301 : vector<16x32xf32>
    %303 = vector.broadcast %283 : vector<1x32xf32> to vector<16x32xf32>
    %304 = arith.mulf %302, %303 : vector<16x32xf32>
    %305 = vector.broadcast %284 : vector<1x32xf32> to vector<16x32xf32>
    %306 = arith.addf %304, %305 : vector<16x32xf32>
    %c344 = arith.constant 344 : index
    %c0_54 = arith.constant 0 : index
    %307 = vector.load %arg1[%c344, %c0_54] : memref<512x128xf32, #tpu.memory_space<vmem>>, vector<32x64xf32>
    %308 = arith.truncf %306 : vector<16x32xf32> to vector<16x32xbf16>
    %309 = arith.truncf %307 : vector<32x64xf32> to vector<32x64xbf16>
    %cst_55 = arith.constant dense<0.000000e+00> : vector<16x64xf32>
    %310 = tpu.matmul %308, %309, %cst_55 {dimension_numbers = #tpu.dot_dimension_numbers<[1], [0], [0], [1], [0, 0, 1, 1], [], []>} : vector<16x32xbf16>, vector<32x64xbf16>, vector<16x64xf32> -> vector<16x64xf32>
    %c376 = arith.constant 376 : index
    %c0_56 = arith.constant 0 : index
    %311 = vector.load %arg1[%c376, %c0_56] : memref<512x128xf32, #tpu.memory_space<vmem>>, vector<1x64xf32>
    %312 = vector.broadcast %311 : vector<1x64xf32> to vector<16x64xf32>
    %313 = arith.addf %310, %312 : vector<16x64xf32>
    %cst_57 = arith.constant 0.000000e+00 : f32
    %314 = vector.broadcast %cst_57 : f32 to vector<16x64xf32>
    %315 = arith.maximumf %313, %314 : vector<16x64xf32>
    %c384 = arith.constant 384 : index
    %c0_58 = arith.constant 0 : index
    %316 = vector.load %arg1[%c384, %c0_58] : memref<512x128xf32, #tpu.memory_space<vmem>>, vector<64x32xf32>
    %317 = arith.truncf %315 : vector<16x64xf32> to vector<16x64xbf16>
    %318 = arith.truncf %316 : vector<64x32xf32> to vector<64x32xbf16>
    %cst_59 = arith.constant dense<0.000000e+00> : vector<16x32xf32>
    %319 = tpu.matmul %317, %318, %cst_59 {dimension_numbers = #tpu.dot_dimension_numbers<[1], [0], [0], [1], [0, 0, 1, 1], [], []>} : vector<16x64xbf16>, vector<64x32xbf16>, vector<16x32xf32> -> vector<16x32xf32>
    %c448 = arith.constant 448 : index
    %c0_60 = arith.constant 0 : index
    %320 = vector.load %arg1[%c448, %c0_60] : memref<512x128xf32, #tpu.memory_space<vmem>>, vector<1x32xf32>
    %321 = vector.broadcast %320 : vector<1x32xf32> to vector<16x32xf32>
    %322 = arith.addf %319, %321 : vector<16x32xf32>
    %323 = arith.addf %306, %322 : vector<16x32xf32>
    %c456 = arith.constant 456 : index
    %c0_61 = arith.constant 0 : index
    %324 = vector.load %arg1[%c456, %c0_61] : memref<512x128xf32, #tpu.memory_space<vmem>>, vector<1x32xf32>
    %c464 = arith.constant 464 : index
    %c0_62 = arith.constant 0 : index
    %325 = vector.load %arg1[%c464, %c0_62] : memref<512x128xf32, #tpu.memory_space<vmem>>, vector<1x32xf32>
    %cst_63 = arith.constant dense<0.000000e+00> : vector<16xf32>
    %326 = vector.multi_reduction <add>, %323, %cst_63 [1] : vector<16x32xf32> to vector<16xf32>
    %327 = vector.shape_cast %326 : vector<16xf32> to vector<16x1xf32>
    %cst_64 = arith.constant 3.200000e+01 : f32
    %328 = vector.broadcast %cst_64 : f32 to vector<16x1xf32>
    %329 = arith.divf %327, %328 : vector<16x1xf32>
    %330 = vector.broadcast %329 : vector<16x1xf32> to vector<16x32xf32>
    %331 = arith.subf %323, %330 : vector<16x32xf32>
    %332 = arith.mulf %331, %331 : vector<16x32xf32>
    %cst_65 = arith.constant dense<0.000000e+00> : vector<16xf32>
    %333 = vector.multi_reduction <add>, %332, %cst_65 [1] : vector<16x32xf32> to vector<16xf32>
    %334 = vector.shape_cast %333 : vector<16xf32> to vector<16x1xf32>
    %cst_66 = arith.constant 3.200000e+01 : f32
    %335 = vector.broadcast %cst_66 : f32 to vector<16x1xf32>
    %336 = arith.divf %334, %335 : vector<16x1xf32>
    %337 = vector.broadcast %329 : vector<16x1xf32> to vector<16x32xf32>
    %338 = arith.subf %323, %337 : vector<16x32xf32>
    %cst_67 = arith.constant 9.99999974E-6 : f32
    %339 = vector.broadcast %cst_67 : f32 to vector<16x1xf32>
    %340 = arith.addf %336, %339 : vector<16x1xf32>
    %341 = math.rsqrt %340 : vector<16x1xf32>
    %342 = vector.broadcast %341 : vector<16x1xf32> to vector<16x32xf32>
    %343 = arith.mulf %338, %342 : vector<16x32xf32>
    %344 = vector.broadcast %324 : vector<1x32xf32> to vector<16x32xf32>
    %345 = arith.mulf %343, %344 : vector<16x32xf32>
    %346 = vector.broadcast %325 : vector<1x32xf32> to vector<16x32xf32>
    %347 = arith.addf %345, %346 : vector<16x32xf32>
    %348 = vector.extract_strided_slice %347 {offsets = [0, 0], sizes = [8, 32], strides = [1, 1]} : vector<16x32xf32> to vector<8x32xf32>
    %cst_68 = arith.constant dense<0.000000e+00> : vector<32xf32>
    %349 = vector.multi_reduction <add>, %348, %cst_68 [0] : vector<8x32xf32> to vector<32xf32>
    %350 = vector.shape_cast %349 : vector<32xf32> to vector<1x32xf32>
    %cst_69 = arith.constant 8.000000e+00 : f32
    %351 = vector.broadcast %cst_69 : f32 to vector<1x32xf32>
    %352 = arith.divf %350, %351 : vector<1x32xf32>
    %353 = vector.extract_strided_slice %347 {offsets = [8, 0], sizes = [8, 32], strides = [1, 1]} : vector<16x32xf32> to vector<8x32xf32>
    %cst_70 = arith.constant dense<0.000000e+00> : vector<32xf32>
    %354 = vector.multi_reduction <add>, %353, %cst_70 [0] : vector<8x32xf32> to vector<32xf32>
    %355 = vector.shape_cast %354 : vector<32xf32> to vector<1x32xf32>
    %cst_71 = arith.constant 8.000000e+00 : f32
    %356 = vector.broadcast %cst_71 : f32 to vector<1x32xf32>
    %357 = arith.divf %355, %356 : vector<1x32xf32>
    %358 = tpu.concatenate %352, %357 in 0 : vector<1x32xf32>, vector<1x32xf32> -> vector<2x32xf32>
    %c472 = arith.constant 472 : index
    %c0_72 = arith.constant 0 : index
    %359 = vector.load %arg1[%c472, %c0_72] : memref<512x128xf32, #tpu.memory_space<vmem>>, vector<32x128xf32>
    %360 = arith.truncf %358 : vector<2x32xf32> to vector<2x32xbf16>
    %361 = arith.truncf %359 : vector<32x128xf32> to vector<32x128xbf16>
    %cst_73 = arith.constant dense<0.000000e+00> : vector<2x128xf32>
    %362 = tpu.matmul %360, %361, %cst_73 {dimension_numbers = #tpu.dot_dimension_numbers<[1], [0], [0], [1], [0, 0, 1, 1], [], []>} : vector<2x32xbf16>, vector<32x128xbf16>, vector<2x128xf32> -> vector<2x128xf32>
    %c504 = arith.constant 504 : index
    %c0_74 = arith.constant 0 : index
    %363 = vector.load %arg1[%c504, %c0_74] : memref<512x128xf32, #tpu.memory_space<vmem>>, vector<1x128xf32>
    %364 = vector.broadcast %363 : vector<1x128xf32> to vector<2x128xf32>
    %365 = arith.addf %362, %364 : vector<2x128xf32>
    %c0_75 = arith.constant 0 : index
    %c0_76 = arith.constant 0 : index
    %366 = vector.load %arg2[%c0_75, %c0_76] : memref<2x128xf32, #tpu.memory_space<vmem>>, vector<2x128xf32>
    tpu.vector_store %arg2[%c0_75, %c0_76], %365 {strides = array<i32>} : memref<2x128xf32, #tpu.memory_space<vmem>>, vector<2x128xf32>,
    return
  }
}

</mosaic_0001>

<bundles_post_ra>
// kernel: tpu_custom_call.1
= control target key start
LH: loop header
LB: loop body
LE: loop exit
PB: predicated region body
PF: predicated region fallthrough
CT: control target
= control target key end

     0   :  { %7 = vsyncpa [#allocation3], 0  ;;  %s3837_s0 = inlined_call_operand.hbm [shape: f32[16,16], index: 0, kind: input, shape index: {}]   ;;  %s3838_s1 = inlined_call_operand.hbm [shape: f32[512,128], index: 1, kind: input, shape index: {}]   ;;  %s3839_s2 = inlined_call_operand.hbm [shape: f32[2,128], index: 2, kind: output, shape index: {}]  }
   0x1   :  { %8 = vsyncpa [#allocation6], 0 }
   0x2   :  { %9 = vsyncpa [#allocation4], 0  ;;  %s3327_s9 = smov [#allocation2]  }
   0x3   :  { %s15_s10 = sshll.u32 %s3327_s9, 4  ;;  %s16_s10 = int_to_ptr.vmem [resolvable:$true] %s15_s10 }
   0x4   :  { %s3269_s11 = scalar_lea.vmem %s16_s10, 256  ;;  %p3274_p1 = scmp.lt.s32.totalorder %s16_s10, %s16_s10 }
   0x5   :  { %p3270_p0 = scmp.ne.s32.totalorder %s16_s10, %s3269_s11  ;;  %p3275_p2 = scmp.lt.s32.totalorder %s3269_s11, %s3269_s11 }
   0x7   :  { %p3276_p3 = por %p3275_p2, %p3274_p1 }
   0x9   :  { %p3277_p4 = pnand %p3276_p3, %p3270_p0 }
   0xb   :  { %3280 = shalt.err (!%p3277_p4)
}
   0xc   :  { %s3328_s12 = smov 128   ;;  %s3329_s13 = smov 8  }
   0xd   :  { %21 = dma.hbm_to_vmem [thread:$0]  %s3837_s0, 256, %s16_s10, [#allocation3], %s3328_s12, %s3328_s12, %s3329_s13  }
   0xe   :  { %s3330_s16 = smov [#allocation5]  }
   0xf   :  { %s27_s17 = sshll.u32 %s3330_s16, 4  ;;  %s28_s17 = int_to_ptr.vmem [resolvable:$true] %s27_s17 }
  0x10   :  { %s3289_s18 = scalar_lea.vmem %s28_s17, 8192  ;;  %p3294_p6 = scmp.lt.s32.totalorder %s28_s17, %s28_s17 }
  0x11   :  { %p3290_p5 = scmp.ne.s32.totalorder %s28_s17, %s3289_s18  ;;  %p3295_p7 = scmp.lt.s32.totalorder %s3289_s18, %s3289_s18 }
  0x13   :  { %p3296_p8 = por %p3295_p7, %p3294_p6 }
  0x15   :  { %p3297_p9 = pnand %p3296_p8, %p3290_p5 }
  0x17   :  { %3300 = shalt.err (!%p3297_p9)
}
  0x18   :  { %33 = dma.hbm_to_vmem [thread:$0]  %s3838_s1, 8192, %s28_s17, [#allocation6], %s3328_s12, %s3328_s12, %s3329_s13  }
  0x19   :  { %3321 = dma.done.wait [#allocation3], 256  }
  0x1a   :  { %3322 = vsyncadd [#allocation3], 4294967040 }
  0x1b   :  { %3323 = dma.done.wait [#allocation6], 8192  }
  0x1c   :  { %3324 = vsyncadd [#allocation6], 4294959104  ;;  %v3331_v0 = vmov 0.0   ;;  %vm3332_vm0 = vmmov 0   ;;  %v43_v1 = vld [vmem:[#allocation5] sm:$0xff]  ;;  %v44_v2 = vld [vmem:[#allocation5 + $0x8] sm:$0xff] }
  0x1d   :  { %2859 = vmatprep.subr.bf16.mxu0 %v3331_v0  ;;  %2861 = vmatprep.mubr.msk.bf16.mxu0 %vm3332_vm0, %v3331_v0  ;;  %v41_v3 = vld [vmem:[#allocation2] sm:$0xff]  ;;  %v46_v4 = vpack.c.bf16 %v44_v2, %v43_v1  ;;  %v42_v5 = vld [vmem:[#allocation2 + $0x8] sm:$0xff]  ;;  %vm52_vm1 = vcmask 130048   ;;  %v99_v7 = vld [vmem:[#allocation5 + $0x28] sm:$0xff]  ;;  %vm109_vm2 = vcmask 261120   ;;  %s3333_s0 = smov 104  }
  0x1e   :  { %2865 = vmatprep.subr.bf16.mxu1 %v3331_v0  ;;  %2869 = vmatprep.mubr.msk.bf16.mxu1 %vm3332_vm0, %v3331_v0  ;;  %v45_v6 = vpack.c.bf16 %v42_v5, %v41_v3  ;;  %v100_v8 = vld [vmem:[#allocation5 + $0x30] sm:$0xff]  ;;  %v97_v10 = vld [vmem:[#allocation5 + $0x18] sm:$0xff]  ;;  %v98_v11 = vld [vmem:[#allocation5 + $0x20] sm:$0xff]  ;;  %s3334_s1 = smov 120   ;;  %s3335_s21 = smov 112   ;;  %vm185_vm3 = vcmask 64512  }
  0x1f   :  { %2860 = vmatpush3.bf16.msra.mxu0 %v46_v4  ;;  %v103_v9 = vpack.c.bf16 %v100_v8, %v99_v7  ;;  %v102_v12 = vpack.c.bf16 %v98_v11, %v97_v10  ;;  %v2702_v14 = vld [vmem:[#allocation5 + $0x10] ss:$0 sm:$0xff]  ;;  %v2704_v21 = vld [vmem:[#allocation5 + $0x38] ss:$0 sm:$0xff]  ;;  %s3336_s22 = smov 96   ;;  %s3337_s23 = smov 64  }
  0x20   :  { %2873 = vmatprep.subr.bf16.mxu0 %v3331_v0  ;;  %vm684_vm4 = vcmask 1043456   ;;  %s3338_s24 = smov 16   ;;  %s3339_s25 = smov 24   ;;  %vm1078_vm5 = vcmask 195584   ;;  %vm1270_vm6 = vcmask 523264   ;;  %vm2628_vm7 = vcmask 1040384  }
  0x21   :  { %2866 = vmatpush3.bf16.msra.mxu1 %v103_v9  ;;  %s3340_s26 = smov [#allocation7]  }
  0x22   :  { %2862 = vmatmul.mubr.msk.bf16.vlgmr.msra.gmra.mxu0 %vm52_vm1, %v45_v6  ;;  %2867 = vmatprep.subr.bf16.mxu1 %v3331_v0  ;;  %s2692_s27 = sshll.u32 %s3340_s26, 4  ;;  %s2693_s27 = int_to_ptr.vmem [resolvable:$true] %s2692_s27 }
  0x23   :  { %2875 = vmatprep.mubr.msk.bf16.mxu0 %vm3332_vm0, %v3331_v0  ;;  %s3301_s28 = scalar_lea.vmem %s2693_s27, 32  ;;  %p3306_p11 = scmp.lt.s32.totalorder %s2693_s27, %s2693_s27 }
  0x24   :  { %p3302_p10 = scmp.ne.s32.totalorder %s2693_s27, %s3301_s28  ;;  %p3307_p12 = scmp.lt.s32.totalorder %s3301_s28, %s3301_s28 }
  0x25   :  { %2868 = vmatpush3.bf16.msra.mxu1 %v102_v12 }
  0x26   :  { %2879 = vmatprep.subr.bf16.mxu1 %v3331_v0  ;;  %p3308_p13 = por %p3307_p12, %p3306_p11 }
  0x28   :  { %p3309_p0 = pnand %p3308_p13, %p3302_p10 }
  0xe2   :  { %v90_v13 = vpop.f32.mrf.mxu0 }
  0xe3   :  { %v3376_v17 = vadd.f32 %v2702_v14, %v90_v13 }
  0xe4   :  { %v2863_v15 = vpop.f32.mrf.mxu0 }
  0xe6   :  { %v93_v16 = vpop.f32.mrf.mxu0 }
  0xe7   :  { %v3378_v18 = vadd.f32 %v2702_v14, %v93_v16 }
  0xe8   :  { %v2864_v19 = vpop.f32.mrf.mxu0 }
  0xe9   :  { %v101_v20 = vpack.c.bf16 %v3378_v18, %v3376_v17 }
  0xeb   :  { %2870 = vmatmul.mubr.msk.bf16.vlgmr.msra.gmra.mxu1 %vm109_vm2, %v101_v20 }
  0xec   :  { %2881 = vmatprep.mubr.msk.bf16.mxu1 %vm3332_vm0, %v3331_v0 }
 0x1ab   :  { %v147_v22 = vpop.f32.mrf.mxu1 }
 0x1ac   :  { %v148_v23 = vadd.f32 %v2704_v21, %v147_v22 }
 0x1ad   :  { %v2871_v24 = vpop.f32.mrf.mxu1 }
 0x1ae   :  { %161 = vrot.lane.b32.xlu1 %v148_v23, %s3333_s0  ;;  %155 = vrot.lane.b32.xlu0 %v148_v23, %s3334_s1  ;;  %v174_v28 = vpack.c.bf16 %v148_v23, %v148_v23 }
 0x1af   :  { %v150_v25 = vpop.f32.mrf.mxu1 }
 0x1b0   :  { %v151_v26 = vadd.f32 %v2704_v21, %v150_v25 }
 0x1b1   :  { %v2872_v27 = vpop.f32.mrf.mxu1 }
 0x1b2   :  { %158 = vrot.lane.b32.xlu0 %v148_v23, %s3335_s21  ;;  %165 = vrot.lane.b32.xlu1 %v151_v26, %s3334_s1  ;;  %v3406_v38 = vpack.c.bf16 %v151_v26, %v151_v26 }
 0x1b6   :  { %168 = vrot.lane.b32.xlu0 %v151_v26, %s3335_s21  ;;  %171 = vrot.lane.b32.xlu1 %v151_v26, %s3333_s0 }
 0x1ba   :  { %183 = vrot.lane.b32.xlu0 %v174_v28, %s3336_s22 }
 0x220   :  { %v162_v29 = vpop.permute.xlu1 %161  ;;  %v156_v30 = vpop.permute.xlu0 %155 }
 0x221   :  { %v3392_v31 = vpack.c.bf16 %v156_v30, %v156_v30  ;;  %v3396_v34 = vpack.c.bf16 %v162_v29, %v162_v29 }
 0x223   :  { %233 = vrot.lane.b32.xlu1 %v3392_v31, %s3336_s22 }
 0x224   :  { %v159_v32 = vpop.permute.xlu0 %158  ;;  %v166_v33 = vpop.permute.xlu1 %165 }
 0x225   :  { %v3398_v35 = vpack.c.bf16 %v159_v32, %v159_v32  ;;  %v3404_v37 = vpack.c.bf16 %v166_v33, %v166_v33 }
 0x227   :  { %282 = vrot.lane.b32.xlu0 %v3398_v35, %s3336_s22  ;;  %331 = vrot.lane.b32.xlu1 %v3396_v34, %s3336_s22 }
 0x228   :  { %v169_v36 = vpop.permute.xlu0 %168  ;;  %v172_v39 = vpop.permute.xlu1 %171 }
 0x229   :  { %v3412_v41 = vpack.c.bf16 %v169_v36, %v169_v36  ;;  %v3414_v42 = vpack.c.bf16 %v172_v39, %v172_v39 }
 0x22b   :  { %429 = vrot.lane.b32.xlu1 %v3404_v37, %s3336_s22  ;;  %380 = vrot.lane.b32.xlu0 %v3406_v38, %s3336_s22 }
 0x22c   :  { %v184_v40 = vpop.permute.xlu0 %183 }
 0x22d   :  { %v190_v43 = vsel %vm185_vm3, %v184_v40, 0 }
 0x22e   :  { %2874 = vmatpush3.bf16.xpose.msra.mxu0 %v190_v43 }
 0x22f   :  { %527 = vrot.lane.b32.xlu1 %v3414_v42, %s3336_s22  ;;  %478 = vrot.lane.b32.xlu0 %v3412_v41, %s3336_s22 }
 0x230   :  { %2885 = vmatprep.subr.bf16.mxu0 %v3331_v0 }
 0x233   :  { %679 = vrot.lane.b32.xlu1 %v174_v28, %s3337_s23 }
 0x235   :  { %2876 = vmatmul.mubr.msk.bf16.vlgmr.msra.gmra.mxu0 %vm185_vm3, %v174_v28 }
 0x236   :  { %2887 = vmatprep.mubr.msk.bf16.mxu0 %vm3332_vm0, %v3331_v0 }
 0x295   :  { %v234_v44 = vpop.permute.xlu1 %233 }
 0x296   :  { %v239_v45 = vsel %vm185_vm3, %v234_v44, 0 }
 0x297   :  { %2880 = vmatpush3.bf16.xpose.msra.mxu1 %v239_v45 }
 0x298   :  { %2891 = vmatprep.subr.bf16.mxu1 %v3331_v0 }
 0x299   :  { %v283_v46 = vpop.permute.xlu0 %282  ;;  %v332_v48 = vpop.permute.xlu1 %331 }
 0x29a   :  { %v288_v47 = vsel %vm185_vm3, %v283_v46, 0  ;;  %v337_v49 = vsel %vm185_vm3, %v332_v48, 0 }
 0x29b   :  { %2886 = vmatpush3.bf16.xpose.msra.mxu0 %v288_v47 }
 0x29c   :  { %2897 = vmatprep.subr.bf16.mxu0 %v3331_v0 }
 0x29d   :  { %v381_v50 = vpop.permute.xlu0 %380  ;;  %v430_v52 = vpop.permute.xlu1 %429 }
 0x29e   :  { %2882 = vmatmul.mubr.msk.bf16.vlgmr.msra.gmra.mxu1 %vm185_vm3, %v3392_v31  ;;  %v386_v51 = vsel %vm185_vm3, %v381_v50, 0  ;;  %v435_v53 = vsel %vm185_vm3, %v430_v52, 0 }
 0x29f   :  { %2892 = vmatpush3.bf16.xpose.msra.mxu1 %v337_v49  ;;  %2893 = vmatprep.mubr.msk.bf16.mxu1 %vm3332_vm0, %v3331_v0 }
 0x2a0   :  { %2903 = vmatprep.subr.bf16.mxu1 %v3331_v0 }
 0x2a1   :  { %v479_v54 = vpop.permute.xlu0 %478  ;;  %v528_v55 = vpop.permute.xlu1 %527 }
 0x2a2   :  { %2888 = vmatmul.mubr.msk.bf16.vlgmr.msra.gmra.mxu0 %vm185_vm3, %v3398_v35  ;;  %v484_v56 = vsel %vm185_vm3, %v479_v54, 0  ;;  %v533_v57 = vsel %vm185_vm3, %v528_v55, 0 }
 0x2a3   :  { %2898 = vmatpush3.bf16.xpose.msra.mxu0 %v386_v51  ;;  %2899 = vmatprep.mubr.msk.bf16.mxu0 %vm3332_vm0, %v3331_v0 }
 0x2a4   :  { %2909 = vmatprep.subr.bf16.mxu0 %v3331_v0 }
 0x2a5   :  { %v680_v58 = vpop.permute.xlu1 %679 }
 0x2a6   :  { %2894 = vmatmul.mubr.msk.bf16.vlgmr.msra.gmra.mxu1 %vm185_vm3, %v3396_v34  ;;  %v686_v59 = vsel %vm684_vm4, %v680_v58, 0 }
 0x2a7   :  { %2904 = vmatpush3.bf16.xpose.msra.mxu1 %v435_v53  ;;  %2905 = vmatprep.mubr.msk.bf16.mxu1 %vm3332_vm0, %v3331_v0 }
 0x2a8   :  { %2915 = vmatprep.subr.bf16.mxu1 %v3331_v0 }
 0x2aa   :  { %2900 = vmatmul.mubr.msk.bf16.vlgmr.msra.gmra.mxu0 %vm185_vm3, %v3406_v38 }
 0x2ab   :  { %2910 = vmatpush3.bf16.xpose.msra.mxu0 %v484_v56  ;;  %2911 = vmatprep.mubr.msk.bf16.mxu0 %vm3332_vm0, %v3331_v0 }
 0x2ac   :  { %2921 = vmatprep.subr.bf16.mxu0 %v3331_v0 }
 0x2ae   :  { %2906 = vmatmul.mubr.msk.bf16.vlgmr.msra.gmra.mxu1 %vm185_vm3, %v3404_v37 }
 0x2af   :  { %2916 = vmatpush3.bf16.xpose.msra.mxu1 %v533_v57  ;;  %2917 = vmatprep.mubr.msk.bf16.mxu1 %vm3332_vm0, %v3331_v0 }
 0x2b0   :  { %2927 = vmatprep.subr.bf16.mxu1 %v3331_v0 }
 0x2b2   :  { %2912 = vmatmul.mubr.msk.bf16.vlgmr.msra.gmra.mxu0 %vm185_vm3, %v3412_v41 }
 0x2b3   :  { %2922 = vmatpush3.bf16.msra.mxu0 %v686_v59  ;;  %2923 = vmatprep.mubr.msk.bf16.mxu0 %vm3332_vm0, %v3331_v0 }
 0x2b4   :  { %2933 = vmatprep.subr.bf16.mxu0 %v3331_v0 }
 0x2b6   :  { %2918 = vmatmul.mubr.msk.bf16.vlgmr.msra.gmra.mxu1 %vm185_vm3, %v3414_v42 }
 0x2b7   :  { %2929 = vmatprep.mubr.msk.bf16.mxu1 %vm3332_vm0, %v3331_v0 }
 0x2f5   :  { %v226_v60 = vpop.f32.mrf.mxu0 }
 0x2f6   :  { %v575_v61 = vmul.f32 0.35355338, %v226_v60 }
 0x2f7   :  { %v2877_v62 = vpop.f32.mrf.mxu0 }
 0x2f8   :  { %v583_v63 = vsel %vm185_vm3, %v575_v61, -inf }
 0x2f9   :  { %584 = vmax.xlane.f32.xlu0 %v583_v63  ;;  %v229_v1 = vpop.f32.mrf.mxu0 }
 0x2fb   :  { %v2878_v2 = vpop.f32.mrf.mxu0 }
 0x35e   :  { %v275_v3 = vpop.f32.mrf.mxu1 }
 0x35f   :  { %v576_v4 = vmul.f32 0.35355338, %v275_v3 }
 0x360   :  { %v2883_v5 = vpop.f32.mrf.mxu1 }
 0x361   :  { %v586_v6 = vsel %vm185_vm3, %v576_v4, -inf }
 0x362   :  { %587 = vmax.xlane.f32.xlu1 %v586_v6  ;;  %v278_v7 = vpop.f32.mrf.mxu1  ;;  %v324_v8 = vpop.f32.mrf.mxu0 }
 0x363   :  { %v577_v9 = vmul.f32 0.35355338, %v324_v8 }
 0x364   :  { %v2884_v10 = vpop.f32.mrf.mxu1  ;;  %v2889_v11 = vpop.f32.mrf.mxu0 }
 0x365   :  { %v589_v12 = vsel %vm185_vm3, %v577_v9, -inf }
 0x366   :  { %v373_v13 = vpop.f32.mrf.mxu1  ;;  %590 = vmax.xlane.f32.xlu0 %v589_v12  ;;  %v327_v14 = vpop.f32.mrf.mxu0 }
 0x367   :  { %v578_v15 = vmul.f32 0.35355338, %v373_v13 }
 0x368   :  { %v2890_v16 = vpop.f32.mrf.mxu0  ;;  %v2895_v19 = vpop.f32.mrf.mxu1 }
 0x369   :  { %v592_v20 = vsel %vm185_vm3, %v578_v15, -inf }
 0x36a   :  { %v376_v21 = vpop.f32.mrf.mxu1  ;;  %593 = vmax.xlane.f32.xlu0 %v592_v20  ;;  %v422_v22 = vpop.f32.mrf.mxu0 }
 0x36b   :  { %v3474_v23 = vmul.f32 0.35355338, %v422_v22 }
 0x36c   :  { %v2896_v24 = vpop.f32.mrf.mxu1  ;;  %v2901_v25 = vpop.f32.mrf.mxu0 }
 0x36d   :  { %v595_v26 = vsel %vm185_vm3, %v3474_v23, -inf }
 0x36e   :  { %v471_v27 = vpop.f32.mrf.mxu1  ;;  %596 = vmax.xlane.f32.xlu1 %v595_v26  ;;  %v425_v28 = vpop.f32.mrf.mxu0 }
 0x36f   :  { %v3478_v29 = vmul.f32 0.35355338, %v471_v27 }
 0x370   :  { %v2902_v30 = vpop.f32.mrf.mxu0  ;;  %v2907_v32 = vpop.f32.mrf.mxu1 }
 0x371   :  { %v598_v33 = vsel %vm185_vm3, %v3478_v29, -inf }
 0x372   :  { %v474_v36 = vpop.f32.mrf.mxu1  ;;  %599 = vmax.xlane.f32.xlu0 %v598_v33  ;;  %v520_v39 = vpop.f32.mrf.mxu0 }
 0x373   :  { %v581_v40 = vmul.f32 0.35355338, %v520_v39 }
 0x374   :  { %v2908_v43 = vpop.f32.mrf.mxu1  ;;  %v2913_v44 = vpop.f32.mrf.mxu0 }
 0x375   :  { %v601_v45 = vsel %vm185_vm3, %v581_v40, -inf }
 0x376   :  { %v569_v46 = vpop.f32.mrf.mxu1  ;;  %602 = vmax.xlane.f32.xlu1 %v601_v45  ;;  %v523_v47 = vpop.f32.mrf.mxu0 }
 0x377   :  { %v582_v48 = vmul.f32 0.35355338, %v569_v46 }
 0x378   :  { %v2914_v49 = vpop.f32.mrf.mxu0  ;;  %v2919_v50 = vpop.f32.mrf.mxu1 }
 0x379   :  { %v604_v51 = vsel %vm185_vm3, %v582_v48, -inf }
 0x37a   :  { %v572_v52 = vpop.f32.mrf.mxu1  ;;  %605 = vmax.xlane.f32.xlu0 %v604_v51 }
 0x37c   :  { %v2920_v53 = vpop.f32.mrf.mxu1 }
 0x382   :  { %v585_v54 = vpop.xlane.xlu0 %584 }
 0x383   :  { %v607_v55 = vsub.f32 %v575_v61, %v585_v54 }
 0x385   :  { %v615_v56 = vmul.f32 1.442695, %v607_v55 }
 0x387   :  { %776 = vrot.lane.b32.xlu1 %v3398_v35, %s3337_s23  ;;  %3181 = vpow2.f32 %v615_v56 }
 0x38b   :  { %824 = vrot.lane.b32.xlu1 %v3396_v34, %s3337_s23 }
 0x390   :  { %728 = vrot.lane.b32.xlu0 %v3392_v31, %s3337_s23 }
 0x394   :  { %v3490_v57 = vpop.eup %3181 }
 0x395   :  { %v631_v58 = vsel %vm185_vm3, %v3490_v57, 0.0 }
 0x3af   :  { %632 = vadd.xlane.f32.xlu1 %v631_v58 }
 0x3eb   :  { %v588_v59 = vpop.xlane.xlu1 %587 }
 0x3ec   :  { %v608_v60 = vsub.f32 %v576_v4, %v588_v59 }
 0x3ee   :  { %v617_v62 = vmul.f32 1.442695, %v608_v60 }
 0x3ef   :  { %v591_v35 = vpop.xlane.xlu0 %590 }
 0x3f0   :  { %3183 = vpow2.f32 %v617_v62  ;;  %v609_v63 = vsub.f32 %v577_v9, %v591_v35 }
 0x3f2   :  { %v619_v34 = vmul.f32 1.442695, %v609_v63 }
 0x3f3   :  { %v594_v1 = vpop.xlane.xlu0 %593 }
 0x3f4   :  { %3185 = vpow2.f32 %v619_v34  ;;  %v610_v31 = vsub.f32 %v578_v15, %v594_v1 }
 0x3f6   :  { %v621_v2 = vmul.f32 1.442695, %v610_v31 }
 0x3f7   :  { %v597_v12 = vpop.xlane.xlu1 %596 }
 0x3f8   :  { %3187 = vpow2.f32 %v621_v2  ;;  %v611_v13 = vsub.f32 %v3474_v23, %v597_v12 }
 0x3fa   :  { %v623_v16 = vmul.f32 1.442695, %v611_v13 }
 0x3fb   :  { %v600_v5 = vpop.xlane.xlu0 %599 }
 0x3fc   :  { %v612_v15 = vsub.f32 %v3478_v29, %v600_v5  ;;  %3189 = vpow2.f32 %v623_v16 }
 0x3fd   :  { %v3494_v61 = vpop.eup %3183 }
 0x3fe   :  { %v634_v3 = vsel %vm185_vm3, %v3494_v61, 0.0  ;;  %v625_v20 = vmul.f32 1.442695, %v612_v15 }
 0x3ff   :  { %635 = vadd.xlane.f32.xlu0 %v634_v3  ;;  %v603_v14 = vpop.xlane.xlu1 %602 }
 0x400   :  { %v613_v19 = vsub.f32 %v581_v40, %v603_v14  ;;  %3191 = vpow2.f32 %v625_v20 }
 0x401   :  { %v3498_v6 = vpop.eup %3185 }
 0x402   :  { %v637_v4 = vsel %vm185_vm3, %v3498_v6, 0.0  ;;  %v627_v21 = vmul.f32 1.442695, %v613_v19 }
 0x403   :  { %v606_v7 = vpop.xlane.xlu0 %605  ;;  %638 = vadd.xlane.f32.xlu1 %v637_v4  ;;  %v777_v25 = vpop.permute.xlu1 %776 }
 0x404   :  { %v614_v22 = vsub.f32 %v582_v48, %v606_v7  ;;  %3193 = vpow2.f32 %v627_v21  ;;  %v782_v43 = vsel %vm684_vm4, %v777_v25, 0 }
 0x405   :  { %v3502_v8 = vpop.eup %3187 }
 0x406   :  { %v640_v9 = vsel %vm185_vm3, %v3502_v8, 0.0  ;;  %v629_v24 = vmul.f32 1.442695, %v614_v22 }
 0x407   :  { %641 = vadd.xlane.f32.xlu0 %v640_v9  ;;  %v729_v10 = vpop.permute.xlu0 %728  ;;  %v825_v26 = vpop.permute.xlu1 %824 }
 0x408   :  { %v734_v11 = vsel %vm684_vm4, %v729_v10, 0  ;;  %3195 = vpow2.f32 %v629_v24  ;;  %v830_v51 = vsel %vm684_vm4, %v825_v26, 0 }
 0x409   :  { %2928 = vmatpush3.bf16.msra.mxu1 %v734_v11 }
 0x40a   :  { %2939 = vmatprep.subr.bf16.mxu1 %v3331_v0 }
 0x414   :  { %920 = vrot.lane.b32.xlu1 %v3404_v37, %s3337_s23  ;;  %v3514_v37 = vpop.eup %3189 }
 0x415   :  { %v643_v23 = vsel %vm185_vm3, %v3514_v37, 0.0 }
 0x41d   :  { %872 = vrot.lane.b32.xlu0 %v3406_v38, %s3337_s23  ;;  %v3516_v38 = vpop.eup %3191 }
 0x41e   :  { %v3520_v27 = vpop.eup %3193  ;;  %v646_v29 = vsel %vm185_vm3, %v3516_v38, 0.0 }
 0x41f   :  { %v649_v30 = vsel %vm185_vm3, %v3520_v27, 0.0  ;;  %v3526_v32 = vpop.eup %3195 }
 0x420   :  { %v652_v33 = vsel %vm185_vm3, %v3526_v32, 0.0 }
 0x438   :  { %644 = vadd.xlane.f32.xlu1 %v643_v23  ;;  %v633_v28 = vpop.xlane.xlu1 %632 }
 0x439   :  { %3197 = vrcp.f32 %v633_v28 }
 0x43c   :  { %647 = vadd.xlane.f32.xlu0 %v646_v29  ;;  %650 = vadd.xlane.f32.xlu1 %v649_v30  ;;  %v1097_v29 = vld [vmem:[#allocation5 + $0x50] sm:$0xff]  ;;  %v1098_v30 = vld [vmem:[#allocation5 + $0x58] sm:$0xff] }
 0x440   :  { %653 = vadd.xlane.f32.xlu0 %v652_v33 }
 0x446   :  { %v3198_v36 = vpop.eup %3197 }
 0x447   :  { %v656_v39 = vmul.f32 %v3198_v36, %v3490_v57 }
 0x449   :  { %v671_v40 = vpack.c.bf16 %v656_v39, %v656_v39  ;;  %v1095_v39 = vld [vmem:[#allocation5 + $0x40] sm:$0xff] }
 0x44b   :  { %2924 = vmatmul.mubr.msk.bf16.vlgmr.msra.gmra.mxu0 %vm185_vm3, %v671_v40  ;;  %v1096_v40 = vld [vmem:[#allocation5 + $0x48] sm:$0xff] }
 0x44c   :  { %2934 = vmatpush3.bf16.msra.mxu0 %v782_v43  ;;  %2935 = vmatprep.mubr.msk.bf16.mxu0 %vm3332_vm0, %v3331_v0  ;;  %v1100_v43 = vpack.c.bf16 %v1096_v40, %v1095_v39  ;;  %v1258_v39 = vld [vmem:[#allocation5 + $0xd0] sm:$0xff]  ;;  %v1259_v40 = vld [vmem:[#allocation5 + $0xd8] sm:$0xff] }
 0x44d   :  { %1016 = vrot.lane.b32.xlu1 %v3414_v42, %s3337_s23  ;;  %2945 = vmatprep.subr.bf16.mxu0 %v3331_v0 }
 0x456   :  { %968 = vrot.lane.b32.xlu0 %v3412_v41, %s3337_s23 }
 0x488   :  { %v636_v44 = vpop.xlane.xlu0 %635 }
 0x489   :  { %3199 = vrcp.f32 %v636_v44 }
 0x48c   :  { %v639_v45 = vpop.xlane.xlu1 %638 }
 0x48d   :  { %3201 = vrcp.f32 %v639_v45 }
 0x490   :  { %v642_v46 = vpop.xlane.xlu0 %641  ;;  %v921_v56 = vpop.permute.xlu1 %920 }
 0x491   :  { %3203 = vrcp.f32 %v642_v46  ;;  %v926_v58 = vsel %vm684_vm4, %v921_v56, 0 }
 0x494   :  { %v873_v52 = vpop.permute.xlu0 %872 }
 0x495   :  { %v878_v54 = vsel %vm684_vm4, %v873_v52, 0 }
 0x496   :  { %v3200_v47 = vpop.eup %3199 }
 0x497   :  { %v658_v48 = vmul.f32 %v3200_v47, %v3494_v61 }
 0x499   :  { %v672_v49 = vpack.c.bf16 %v658_v48, %v658_v48 }
 0x49a   :  { %v3202_v50 = vpop.eup %3201 }
 0x49b   :  { %2930 = vmatmul.mubr.msk.bf16.vlgmr.msra.gmra.mxu1 %vm185_vm3, %v672_v49  ;;  %v660_v42 = vmul.f32 %v3202_v50, %v3498_v6 }
 0x49c   :  { %2940 = vmatpush3.bf16.msra.mxu1 %v830_v51  ;;  %2941 = vmatprep.mubr.msk.bf16.mxu1 %vm3332_vm0, %v3331_v0 }
 0x49d   :  { %v673_v41 = vpack.c.bf16 %v660_v42, %v660_v42  ;;  %2951 = vmatprep.subr.bf16.mxu1 %v3331_v0 }
 0x49e   :  { %v3204_v53 = vpop.eup %3203 }
 0x49f   :  { %2936 = vmatmul.mubr.msk.bf16.vlgmr.msra.gmra.mxu0 %vm185_vm3, %v673_v41  ;;  %v662_v55 = vmul.f32 %v3204_v53, %v3502_v8 }
 0x4a0   :  { %2946 = vmatpush3.bf16.msra.mxu0 %v878_v54  ;;  %2947 = vmatprep.mubr.msk.bf16.mxu0 %vm3332_vm0, %v3331_v0 }
 0x4a1   :  { %v674_v57 = vpack.c.bf16 %v662_v55, %v662_v55  ;;  %2957 = vmatprep.subr.bf16.mxu0 %v3331_v0 }
 0x4a3   :  { %2942 = vmatmul.mubr.msk.bf16.vlgmr.msra.gmra.mxu1 %vm185_vm3, %v674_v57 }
 0x4a4   :  { %2952 = vmatpush3.bf16.msra.mxu1 %v926_v58  ;;  %2953 = vmatprep.mubr.msk.bf16.mxu1 %vm3332_vm0, %v3331_v0 }
 0x4a5   :  { %2963 = vmatprep.subr.bf16.mxu1 %v3331_v0 }
 0x4c1   :  { %v645_v59 = vpop.xlane.xlu1 %644 }
 0x4c2   :  { %3205 = vrcp.f32 %v645_v59 }
 0x4c5   :  { %v648_v60 = vpop.xlane.xlu0 %647  ;;  %v651_v62 = vpop.xlane.xlu1 %650 }
 0x4c6   :  { %3207 = vrcp.f32 %v648_v60 }
 0x4c7   :  { %3209 = vrcp.f32 %v651_v62 }
 0x4c9   :  { %v654_v35 = vpop.xlane.xlu0 %653  ;;  %v1017_v6 = vpop.permute.xlu1 %1016 }
 0x4ca   :  { %3211 = vrcp.f32 %v654_v35  ;;  %v1022_v9 = vsel %vm684_vm4, %v1017_v6, 0 }
 0x4cd   :  { %v969_v1 = vpop.permute.xlu0 %968 }
 0x4ce   :  { %v974_v3 = vsel %vm684_vm4, %v969_v1, 0 }
 0x4cf   :  { %v3206_v63 = vpop.eup %3205 }
 0x4d0   :  { %v664_v34 = vmul.f32 %v3206_v63, %v3514_v37 }
 0x4d2   :  { %v675_v31 = vpack.c.bf16 %v664_v34, %v664_v34 }
 0x4d3   :  { %v3208_v2 = vpop.eup %3207 }
 0x4d4   :  { %v3210_v61 = vpop.eup %3209  ;;  %2948 = vmatmul.mubr.msk.bf16.vlgmr.msra.gmra.mxu0 %vm185_vm3, %v675_v31  ;;  %v666_v5 = vmul.f32 %v3208_v2, %v3516_v38 }
 0x4d5   :  { %2958 = vmatpush3.bf16.msra.mxu0 %v974_v3  ;;  %2959 = vmatprep.mubr.msk.bf16.mxu0 %vm3332_vm0, %v3331_v0  ;;  %v668_v7 = vmul.f32 %v3210_v61, %v3520_v27 }
 0x4d6   :  { %v676_v4 = vpack.c.bf16 %v666_v5, %v666_v5  ;;  %2969 = vmatprep.subr.bf16.mxu0 %v3331_v0 }
 0x4d7   :  { %v3212_v8 = vpop.eup %3211  ;;  %v677_v10 = vpack.c.bf16 %v668_v7, %v668_v7 }
 0x4d8   :  { %2954 = vmatmul.mubr.msk.bf16.vlgmr.msra.gmra.mxu1 %vm185_vm3, %v676_v4  ;;  %v670_v11 = vmul.f32 %v3212_v8, %v3526_v32  ;;  %v1101_v32 = vpack.c.bf16 %v1098_v30, %v1097_v29  ;;  %v1196_v29 = vld [vmem:[#allocation5 + $0x88] sm:$0xff]  ;;  %v1197_v30 = vld [vmem:[#allocation5 + $0x90] sm:$0xff] }
 0x4d9   :  { %2964 = vmatpush3.bf16.msra.mxu1 %v1022_v9  ;;  %2965 = vmatprep.mubr.msk.bf16.mxu1 %vm3332_vm0, %v3331_v0  ;;  %v2722_v9 = vld [vmem:[#allocation5 + $0x60] ss:$0 sm:$0xff] }
 0x4da   :  { %2977 = vmatprep.subr.bf16.mxu1 %v3331_v0  ;;  %v678_v12 = vpack.c.bf16 %v670_v11, %v670_v11 }
 0x4dc   :  { %2960 = vmatmul.mubr.msk.bf16.vlgmr.msra.gmra.mxu0 %vm185_vm3, %v677_v10 }
 0x4dd   :  { %2973 = vmatprep.mubr.msk.bf16.mxu0 %vm3332_vm0, %v3331_v0  ;;  %2970 = vmatpush3.bf16.msra.mxu0 %v1101_v32  ;;  %v1194_v32 = vld [vmem:[#allocation5 + $0x78] sm:$0xff] }
 0x4de   :  { %2971 = vmatprep.subr.bf16.mxu0 %v3331_v0 }
 0x4e0   :  { %2966 = vmatmul.mubr.msk.bf16.vlgmr.msra.gmra.mxu1 %vm185_vm3, %v678_v12 }
 0x4e1   :  { %2981 = vmatprep.mubr.msk.bf16.mxu1 %vm3332_vm0, %v3331_v0  ;;  %2972 = vmatpush3.bf16.msra.mxu0 %v1100_v43  ;;  %v1264_v43 = vpack.c.bf16 %v1259_v40, %v1258_v39  ;;  %v1357_v39 = vld [vmem:[#allocation5 + $0xf8] sm:$0xff]  ;;  %v1358_v40 = vld [vmem:[#allocation5 + $0x100] sm:$0xff] }
 0x4e2   :  { %2985 = vmatprep.subr.bf16.mxu0 %v3331_v0 }
 0x50b   :  { %v722_v13 = vpop.f32.mrf.mxu0 }
 0x50d   :  { %v2925_v14 = vpop.f32.mrf.mxu0 }
 0x50f   :  { %v725_v15 = vpop.f32.mrf.mxu0 }
 0x511   :  { %v2926_v16 = vpop.f32.mrf.mxu0 }
 0x55b   :  { %v770_v19 = vpop.f32.mrf.mxu1 }
 0x55d   :  { %v2931_v20 = vpop.f32.mrf.mxu1 }
 0x55f   :  { %v773_v21 = vpop.f32.mrf.mxu1  ;;  %v818_v22 = vpop.f32.mrf.mxu0 }
 0x561   :  { %v2932_v24 = vpop.f32.mrf.mxu1  ;;  %v2937_v25 = vpop.f32.mrf.mxu0 }
 0x563   :  { %v821_v37 = vpop.f32.mrf.mxu0  ;;  %v866_v26 = vpop.f32.mrf.mxu1 }
 0x565   :  { %v2938_v38 = vpop.f32.mrf.mxu0  ;;  %v2943_v23 = vpop.f32.mrf.mxu1 }
 0x567   :  { %v869_v27 = vpop.f32.mrf.mxu1 }
 0x569   :  { %v2944_v28 = vpop.f32.mrf.mxu1 }
 0x594   :  { %v914_v33 = vpop.f32.mrf.mxu0 }
 0x596   :  { %v2949_v36 = vpop.f32.mrf.mxu0 }
 0x598   :  { %v917_v44 = vpop.f32.mrf.mxu0  ;;  %v962_v45 = vpop.f32.mrf.mxu1 }
 0x599   :  { %v3151_v46 = vpack.i.bf16 %v962_v45, %v770_v19 }
 0x59a   :  { %v2950_v47 = vpop.f32.mrf.mxu0  ;;  %v2955_v48 = vpop.f32.mrf.mxu1 }
 0x59b   :  { %3152 = vrot.lane.b32.xlu0 %v3151_v46, %s3329_s13 }
 0x59c   :  { %v965_v49 = vpop.f32.mrf.mxu1  ;;  %v1010_v50 = vpop.f32.mrf.mxu0 }
 0x59d   :  { %v3156_v51 = vpack.i.bf16 %v1010_v50, %v818_v22 }
 0x59e   :  { %v2956_v42 = vpop.f32.mrf.mxu1  ;;  %v2961_v52 = vpop.f32.mrf.mxu0 }
 0x59f   :  { %3157 = vrot.lane.b32.xlu1 %v3156_v51, %s3338_s24  ;;  %v2724_v42 = vld [vmem:[#allocation5 + $0x68] ss:$0 sm:$0xff] }
 0x5a0   :  { %v1013_v41 = vpop.f32.mrf.mxu0  ;;  %v1058_v53 = vpop.f32.mrf.mxu1 }
 0x5a1   :  { %v3161_v54 = vpack.i.bf16 %v1058_v53, %v866_v26 }
 0x5a2   :  { %v2962_v55 = vpop.f32.mrf.mxu0  ;;  %v2967_v56 = vpop.f32.mrf.mxu1 }
 0x5a3   :  { %3162 = vrot.lane.b32.xlu0 %v3161_v54, %s3339_s25  ;;  %v2725_v54 = vld [vmem:[#allocation5 + $0x70] ss:$0 sm:$0xff] }
 0x5a4   :  { %v1061_v57 = vpop.f32.mrf.mxu1 }
 0x5a6   :  { %v2968_v58 = vpop.f32.mrf.mxu1 }
 0x60d   :  { %v3153_v59 = vpop.permute.xlu0 %3152 }
 0x60e   :  { %v3155_v62 = vunpack.i.h.bf16 %v3153_v59  ;;  %v3154_v35 = vunpack.i.l.bf16 %v3153_v59  ;;  %v1256_v59 = vld [vmem:[#allocation5 + $0xc0] sm:$0xff] }
 0x610   :  { %v1076_v31 = vsel %vm185_vm3, %v722_v13, %v3154_v35  ;;  %v1092_v2 = vsel %vm185_vm3, %v914_v33, %v3155_v62  ;;  %v1195_v33 = vld [vmem:[#allocation5 + $0x80] sm:$0xff]  ;;  %v1254_v35 = vld [vmem:[#allocation5 + $0xb0] sm:$0xff] }
 0x611   :  { %v3158_v60 = vpop.permute.xlu1 %3157  ;;  %v1199_v36 = vpack.c.bf16 %v1195_v33, %v1194_v32  ;;  %v1359_v32 = vld [vmem:[#allocation5 + $0x108] sm:$0xff]  ;;  %v1360_v33 = vld [vmem:[#allocation5 + $0x110] sm:$0xff] }
 0x612   :  { %v3160_v63 = vunpack.i.h.bf16 %v3158_v60  ;;  %v3159_v34 = vunpack.i.l.bf16 %v3158_v60  ;;  %v1257_v60 = vld [vmem:[#allocation5 + $0xc8] sm:$0xff] }
 0x613   :  { %v1263_v62 = vpack.c.bf16 %v1257_v60, %v1256_v59  ;;  %v2732_v59 = vld [vmem:[#allocation5 + $0x118] ss:$0 sm:$0xff] }
 0x614   :  { %v1093_v5 = vsel %vm52_vm1, %v1092_v2, %v3160_v63  ;;  %v1077_v6 = vsel %vm52_vm1, %v1076_v31, %v3159_v34  ;;  %v1255_v63 = vld [vmem:[#allocation5 + $0xb8] sm:$0xff]  ;;  %v1253_v31 = vld [vmem:[#allocation5 + $0xa8] sm:$0xff] }
 0x615   :  { %v3163_v1 = vpop.permute.xlu0 %3162  ;;  %v1262_v34 = vpack.c.bf16 %v1255_v63, %v1254_v35 }
 0x616   :  { %v3165_v61 = vunpack.i.h.bf16 %v3163_v1  ;;  %v3164_v3 = vunpack.i.l.bf16 %v3163_v1  ;;  %v1252_v1 = vld [vmem:[#allocation5 + $0xa0] sm:$0xff] }
 0x617   :  { %v1261_v2 = vpack.c.bf16 %v1253_v31, %v1252_v1 }
 0x618   :  { %v1079_v4 = vsel %vm1078_vm5, %v1077_v6, %v3164_v3  ;;  %v1094_v7 = vsel %vm1078_vm5, %v1093_v5, %v3165_v61  ;;  %v2726_v61 = vld [vmem:[#allocation5 + $0x98] ss:$0 sm:$0xff] }
 0x619   :  { %v1099_v8 = vpack.c.bf16 %v1094_v7, %v1079_v4 }
 0x61b   :  { %2974 = vmatmul.mubr.msk.bf16.vlgmr.msra.gmra.mxu0 %vm109_vm2, %v1099_v8 }
 0x61c   :  { %2993 = vmatprep.mubr.msk.bf16.mxu0 %vm3332_vm0, %v3331_v0  ;;  %2986 = vmatpush3.bf16.msra.mxu0 %v1264_v43  ;;  %v1362_v43 = vpack.c.bf16 %v1358_v40, %v1357_v39 }
 0x61d   :  { %2987 = vmatprep.subr.bf16.mxu0 %v3331_v0 }
 0x620   :  { %2988 = vmatpush3.bf16.msra.mxu0 %v1263_v62 }
 0x621   :  { %2989 = vmatprep.subr.bf16.mxu0 %v3331_v0 }
 0x624   :  { %2990 = vmatpush3.bf16.msra.mxu0 %v1262_v34 }
 0x625   :  { %2991 = vmatprep.subr.bf16.mxu0 %v3331_v0 }
 0x628   :  { %2992 = vmatpush3.bf16.msra.mxu0 %v1261_v2 }
 0x629   :  { %3011 = vmatprep.subr.bf16.mxu0 %v3331_v0 }
 0x6db   :  { %v1144_v10 = vpop.f32.mrf.mxu0 }
 0x6dc   :  { %v1145_v11 = vadd.f32 %v2722_v9, %v1144_v10 }
 0x6dd   :  { %v2975_v12 = vpop.f32.mrf.mxu0 }
 0x6de   :  { %v1151_v13 = vadd.f32 %v1145_v11, %v3376_v17  ;;  %v2728_v12 = vld [vmem:[#allocation5 + $0xe0] ss:$0 sm:$0xff] }
 0x6df   :  { %v1147_v14 = vpop.f32.mrf.mxu0 }
 0x6e0   :  { %v1148_v15 = vadd.f32 %v2722_v9, %v1147_v14  ;;  %v1155_v16 = vsel %vm109_vm2, %v1151_v13, 0.0 }
 0x6e1   :  { %1156 = vadd.xlane.f32.xlu1 %v1155_v16  ;;  %v2976_v19 = vpop.f32.mrf.mxu0 }
 0x6e2   :  { %v1152_v20 = vadd.f32 %v1148_v15, %v3378_v18  ;;  %v1200_v18 = vpack.c.bf16 %v1197_v30, %v1196_v29 }
 0x6e4   :  { %v1158_v21 = vsel %vm109_vm2, %v1152_v20, 0.0  ;;  %2978 = vmatpush3.bf16.msra.mxu1 %v1200_v18 }
 0x6e5   :  { %1159 = vadd.xlane.f32.xlu0 %v1158_v21  ;;  %2979 = vmatprep.subr.bf16.mxu1 %v3331_v0 }
 0x6e8   :  { %2980 = vmatpush3.bf16.msra.mxu1 %v1199_v36  ;;  %v1363_v36 = vpack.c.bf16 %v1360_v33, %v1359_v32 }
 0x6e9   :  { %2997 = vmatprep.subr.bf16.mxu1 %v3331_v0 }
 0x76a   :  { %v1157_v22 = vpop.xlane.xlu1 %1156 }
 0x76b   :  { %v1162_v24 = vmul.f32 0.03125, %v1157_v22 }
 0x76d   :  { %v1164_v25 = vsub.f32 %v1151_v13, %v1162_v24 }
 0x76e   :  { %v1160_v37 = vpop.xlane.xlu0 %1159 }
 0x76f   :  { %v1163_v26 = vmul.f32 0.03125, %v1160_v37  ;;  %v1166_v38 = vmul.f32 %v1164_v25, %v1164_v25 }
 0x771   :  { %v1165_v23 = vsub.f32 %v1152_v20, %v1163_v26  ;;  %v1168_v17 = vsel %vm109_vm2, %v1166_v38, 0.0 }
 0x772   :  { %1169 = vadd.xlane.f32.xlu0 %v1168_v17 }
 0x773   :  { %v1167_v27 = vmul.f32 %v1165_v23, %v1165_v23 }
 0x775   :  { %v1171_v28 = vsel %vm109_vm2, %v1167_v27, 0.0 }
 0x776   :  { %1172 = vadd.xlane.f32.xlu1 %v1171_v28 }
 0x7fb   :  { %v1170_v44 = vpop.xlane.xlu0 %1169 }
 0x7fc   :  { %v1174_v45 = vmul.f32 0.03125, %v1170_v44 }
 0x7fe   :  { %v1176_v46 = vadd.f32 1e-05, %v1174_v45 }
 0x7ff   :  { %v1173_v47 = vpop.xlane.xlu1 %1172 }
 0x800   :  { %3213 = vrsqrt.f32 %v1176_v46  ;;  %v1175_v48 = vmul.f32 0.03125, %v1173_v47 }
 0x802   :  { %v1177_v49 = vadd.f32 1e-05, %v1175_v48 }
 0x804   :  { %3215 = vrsqrt.f32 %v1177_v49 }
 0x80d   :  { %v3214_v50 = vpop.eup %3213 }
 0x80e   :  { %v1180_v51 = vmul.f32 %v3214_v50, %v1164_v25 }
 0x810   :  { %v1186_v53 = vmul.f32 %v2724_v42, %v1180_v51 }
 0x811   :  { %v3216_v52 = vpop.eup %3215 }
 0x812   :  { %v1181_v41 = vmul.f32 %v3216_v52, %v1165_v23  ;;  %v1192_v56 = vadd.f32 %v2725_v54, %v1186_v53 }
 0x814   :  { %v1187_v55 = vmul.f32 %v2724_v42, %v1181_v41  ;;  %v2730_v42 = vld [vmem:[#allocation5 + $0xe8] ss:$0 sm:$0xff] }
 0x816   :  { %v1193_v57 = vadd.f32 %v2725_v54, %v1187_v55  ;;  %v2731_v54 = vld [vmem:[#allocation5 + $0xf0] ss:$0 sm:$0xff] }
 0x818   :  { %v1198_v58 = vpack.c.bf16 %v1193_v57, %v1192_v56 }
 0x81a   :  { %2982 = vmatmul.mubr.msk.bf16.vlgmr.msra.gmra.mxu1 %vm109_vm2, %v1198_v58 }
 0x81b   :  { %3001 = vmatprep.mubr.msk.bf16.mxu1 %vm3332_vm0, %v3331_v0  ;;  %2998 = vmatpush3.bf16.msra.mxu1 %v1363_v36 }
 0x81c   :  { %2999 = vmatprep.subr.bf16.mxu1 %v3331_v0 }
 0x81f   :  { %3000 = vmatpush3.bf16.msra.mxu1 %v1362_v43 }
 0x820   :  { %3005 = vmatprep.subr.bf16.mxu1 %v3331_v0 }
 0x8da   :  { %v1243_v3 = vpop.f32.mrf.mxu1 }
 0x8db   :  { %v1244_v6 = vadd.f32 %v2726_v61, %v1243_v3 }
 0x8dc   :  { %v2983_v5 = vpop.f32.mrf.mxu1 }
 0x8dd   :  { %v1250_v9 = vmax.f32 %v1244_v6, 0.0 }
 0x8de   :  { %v1246_v4 = vpop.f32.mrf.mxu1 }
 0x8df   :  { %v1247_v7 = vadd.f32 %v2726_v61, %v1246_v4 }
 0x8e0   :  { %v2984_v8 = vpop.f32.mrf.mxu1 }
 0x8e1   :  { %v1251_v10 = vmax.f32 %v1247_v7, 0.0 }
 0x8e3   :  { %v1260_v11 = vpack.c.bf16 %v1251_v10, %v1250_v9 }
 0x8e5   :  { %2994 = vmatmul.mubr.msk.bf16.vlgmr.msra.gmra.mxu0 %vm1270_vm6, %v1260_v11 }
 0x8e6   :  { %3013 = vmatprep.mubr.msk.bf16.mxu0 %vm3332_vm0, %v3331_v0 }
 0x9a5   :  { %v1308_v13 = vpop.f32.mrf.mxu0 }
 0x9a6   :  { %v1309_v14 = vadd.f32 %v2728_v12, %v1308_v13 }
 0x9a7   :  { %v2995_v15 = vpop.f32.mrf.mxu0 }
 0x9a8   :  { %v1315_v16 = vadd.f32 %v1309_v14, %v1192_v56 }
 0x9a9   :  { %v1311_v19 = vpop.f32.mrf.mxu0 }
 0x9aa   :  { %v1312_v20 = vadd.f32 %v2728_v12, %v1311_v19  ;;  %v1319_v21 = vsel %vm109_vm2, %v1315_v16, 0.0 }
 0x9ab   :  { %1320 = vadd.xlane.f32.xlu0 %v1319_v21  ;;  %v2996_v22 = vpop.f32.mrf.mxu0 }
 0x9ac   :  { %v1316_v24 = vadd.f32 %v1312_v20, %v1193_v57 }
 0x9ae   :  { %v1322_v25 = vsel %vm109_vm2, %v1316_v24, 0.0 }
 0x9af   :  { %1323 = vadd.xlane.f32.xlu1 %v1322_v25 }
 0xa34   :  { %v1321_v37 = vpop.xlane.xlu0 %1320 }
 0xa35   :  { %v1325_v26 = vmul.f32 0.03125, %v1321_v37 }
 0xa37   :  { %v1327_v38 = vsub.f32 %v1315_v16, %v1325_v26 }
 0xa38   :  { %v1324_v23 = vpop.xlane.xlu1 %1323 }
 0xa39   :  { %v1326_v17 = vmul.f32 0.03125, %v1324_v23  ;;  %v1329_v27 = vmul.f32 %v1327_v38, %v1327_v38 }
 0xa3b   :  { %v1328_v28 = vsub.f32 %v1316_v24, %v1326_v17  ;;  %v1331_v29 = vsel %vm109_vm2, %v1329_v27, 0.0 }
 0xa3c   :  { %1332 = vadd.xlane.f32.xlu0 %v1331_v29 }
 0xa3d   :  { %v1330_v30 = vmul.f32 %v1328_v28, %v1328_v28 }
 0xa3f   :  { %v1334_v18 = vsel %vm109_vm2, %v1330_v30, 0.0 }
 0xa40   :  { %1335 = vadd.xlane.f32.xlu1 %v1334_v18 }
 0xac5   :  { %v1333_v44 = vpop.xlane.xlu0 %1332 }
 0xac6   :  { %v1337_v45 = vmul.f32 0.03125, %v1333_v44 }
 0xac8   :  { %v1339_v46 = vadd.f32 1e-05, %v1337_v45 }
 0xac9   :  { %v1336_v47 = vpop.xlane.xlu1 %1335 }
 0xaca   :  { %3217 = vrsqrt.f32 %v1339_v46  ;;  %v1338_v48 = vmul.f32 0.03125, %v1336_v47 }
 0xacc   :  { %v1340_v49 = vadd.f32 1e-05, %v1338_v48 }
 0xace   :  { %3219 = vrsqrt.f32 %v1340_v49 }
 0xad7   :  { %v3218_v50 = vpop.eup %3217 }
 0xad8   :  { %v1343_v51 = vmul.f32 %v3218_v50, %v1327_v38 }
 0xada   :  { %v1349_v53 = vmul.f32 %v2730_v42, %v1343_v51 }
 0xadb   :  { %v3220_v52 = vpop.eup %3219 }
 0xadc   :  { %v1344_v41 = vmul.f32 %v3220_v52, %v1328_v28  ;;  %v3616_v56 = vadd.f32 %v2731_v54, %v1349_v53 }
 0xade   :  { %v1350_v55 = vmul.f32 %v2730_v42, %v1344_v41 }
 0xae0   :  { %v3618_v57 = vadd.f32 %v2731_v54, %v1350_v55 }
 0xae2   :  { %v1361_v58 = vpack.c.bf16 %v3618_v57, %v3616_v56 }
 0xae4   :  { %3002 = vmatmul.mubr.msk.bf16.vlgmr.msra.gmra.mxu1 %vm109_vm2, %v1361_v58 }
 0xae5   :  { %3007 = vmatprep.mubr.msk.bf16.mxu1 %vm3332_vm0, %v3331_v0 }
 0xba4   :  { %v1406_v60 = vpop.f32.mrf.mxu1 }
 0xba5   :  { %v1407_v62 = vadd.f32 %v2732_v59, %v1406_v60 }
 0xba6   :  { %v3003_v35 = vpop.f32.mrf.mxu1 }
 0xba7   :  { %1417 = vrot.lane.b32.xlu1 %v1407_v62, %s3335_s21  ;;  %1414 = vrot.lane.b32.xlu0 %v1407_v62, %s3334_s1  ;;  %v1433_v31 = vpack.c.bf16 %v1407_v62, %v1407_v62 }
 0xba8   :  { %v1409_v63 = vpop.f32.mrf.mxu1 }
 0xba9   :  { %v1410_v34 = vadd.f32 %v2732_v59, %v1409_v63 }
 0xbaa   :  { %v3004_v1 = vpop.f32.mrf.mxu1 }
 0xbab   :  { %1420 = vrot.lane.b32.xlu1 %v1407_v62, %s3333_s0  ;;  %1424 = vrot.lane.b32.xlu0 %v1410_v34, %s3334_s1  ;;  %v3639_v8 = vpack.c.bf16 %v1410_v34, %v1410_v34 }
 0xbaf   :  { %1427 = vrot.lane.b32.xlu1 %v1410_v34, %s3335_s21  ;;  %1430 = vrot.lane.b32.xlu0 %v1410_v34, %s3333_s0 }
 0xbb3   :  { %1442 = vrot.lane.b32.xlu1 %v1433_v31, %s3336_s22 }
 0xc19   :  { %v1418_v2 = vpop.permute.xlu1 %1417  ;;  %v1415_v61 = vpop.permute.xlu0 %1414 }
 0xc1a   :  { %v3632_v3 = vpack.c.bf16 %v1418_v2, %v1418_v2  ;;  %v1434_v5 = vpack.c.bf16 %v1415_v61, %v1415_v61 }
 0xc1c   :  { %1540 = vrot.lane.b32.xlu1 %v3632_v3, %s3336_s22  ;;  %1491 = vrot.lane.b32.xlu0 %v1434_v5, %s3336_s22 }
 0xc1d   :  { %v1421_v6 = vpop.permute.xlu1 %1420  ;;  %v1425_v4 = vpop.permute.xlu0 %1424 }
 0xc1e   :  { %v3637_v7 = vpack.c.bf16 %v1421_v6, %v1421_v6  ;;  %v3645_v10 = vpack.c.bf16 %v1425_v4, %v1425_v4 }
 0xc20   :  { %1589 = vrot.lane.b32.xlu0 %v3637_v7, %s3336_s22  ;;  %1638 = vrot.lane.b32.xlu1 %v3639_v8, %s3336_s22 }
 0xc21   :  { %v1428_v9 = vpop.permute.xlu1 %1427  ;;  %v1431_v12 = vpop.permute.xlu0 %1430 }
 0xc22   :  { %v3647_v11 = vpack.c.bf16 %v1428_v9, %v1428_v9  ;;  %v3653_v14 = vpack.c.bf16 %v1431_v12, %v1431_v12 }
 0xc24   :  { %1687 = vrot.lane.b32.xlu0 %v3645_v10, %s3336_s22  ;;  %1736 = vrot.lane.b32.xlu1 %v3647_v11, %s3336_s22 }
 0xc25   :  { %v1443_v13 = vpop.permute.xlu1 %1442 }
 0xc26   :  { %v1448_v15 = vsel %vm185_vm3, %v1443_v13, 0 }
 0xc27   :  { %3006 = vmatpush3.bf16.xpose.msra.mxu1 %v1448_v15 }
 0xc28   :  { %1785 = vrot.lane.b32.xlu0 %v3653_v14, %s3336_s22  ;;  %1985 = vrot.lane.b32.xlu1 %v1434_v5, %s3337_s23 }
 0xc29   :  { %3017 = vmatprep.subr.bf16.mxu1 %v3331_v0 }
 0xc2c   :  { %1937 = vrot.lane.b32.xlu0 %v1433_v31, %s3337_s23 }
 0xc2e   :  { %3008 = vmatmul.mubr.msk.bf16.vlgmr.msra.gmra.mxu1 %vm185_vm3, %v1433_v31 }
 0xc2f   :  { %3019 = vmatprep.mubr.msk.bf16.mxu1 %vm3332_vm0, %v3331_v0 }
 0xc8e   :  { %v1541_v16 = vpop.permute.xlu1 %1540  ;;  %v1492_v19 = vpop.permute.xlu0 %1491 }
 0xc8f   :  { %v1546_v20 = vsel %vm185_vm3, %v1541_v16, 0  ;;  %v1497_v21 = vsel %vm185_vm3, %v1492_v19, 0 }
 0xc90   :  { %3012 = vmatpush3.bf16.xpose.msra.mxu0 %v1497_v21  ;;  %3018 = vmatpush3.bf16.xpose.msra.mxu1 %v1546_v20 }
 0xc91   :  { %3023 = vmatprep.subr.bf16.mxu0 %v3331_v0  ;;  %3029 = vmatprep.subr.bf16.mxu1 %v3331_v0 }
 0xc92   :  { %v1590_v22 = vpop.permute.xlu0 %1589  ;;  %v1639_v24 = vpop.permute.xlu1 %1638 }
 0xc93   :  { %v1595_v25 = vsel %vm185_vm3, %v1590_v22, 0  ;;  %v1644_v37 = vsel %vm185_vm3, %v1639_v24, 0 }
 0xc96   :  { %v1688_v26 = vpop.permute.xlu0 %1687  ;;  %v1737_v38 = vpop.permute.xlu1 %1736 }
 0xc97   :  { %3014 = vmatmul.mubr.msk.bf16.vlgmr.msra.gmra.mxu0 %vm185_vm3, %v1434_v5  ;;  %3020 = vmatmul.mubr.msk.bf16.vlgmr.msra.gmra.mxu1 %vm185_vm3, %v3632_v3  ;;  %v1693_v17 = vsel %vm185_vm3, %v1688_v26, 0  ;;  %v1742_v27 = vsel %vm185_vm3, %v1737_v38, 0 }
 0xc98   :  { %3024 = vmatpush3.bf16.xpose.msra.mxu0 %v1595_v25  ;;  %3030 = vmatpush3.bf16.xpose.msra.mxu1 %v1644_v37 }
 0xc99   :  { %3025 = vmatprep.mubr.msk.bf16.mxu0 %vm3332_vm0, %v3331_v0  ;;  %3031 = vmatprep.mubr.msk.bf16.mxu1 %vm3332_vm0, %v3331_v0 }
 0xc9a   :  { %3035 = vmatprep.subr.bf16.mxu0 %v3331_v0  ;;  %3041 = vmatprep.subr.bf16.mxu1 %v3331_v0  ;;  %v1786_v23 = vpop.permute.xlu0 %1785  ;;  %v1986_v18 = vpop.permute.xlu1 %1985 }
 0xc9b   :  { %v1791_v29 = vsel %vm185_vm3, %v1786_v23, 0  ;;  %v1991_v32 = vsel %vm684_vm4, %v1986_v18, 0 }
 0xc9e   :  { %v1938_v28 = vpop.permute.xlu0 %1937 }
 0xc9f   :  { %3026 = vmatmul.mubr.msk.bf16.vlgmr.msra.gmra.mxu0 %vm185_vm3, %v3637_v7  ;;  %3032 = vmatmul.mubr.msk.bf16.vlgmr.msra.gmra.mxu1 %vm185_vm3, %v3639_v8  ;;  %v1943_v30 = vsel %vm684_vm4, %v1938_v28, 0 }
 0xca0   :  { %3036 = vmatpush3.bf16.xpose.msra.mxu0 %v1693_v17  ;;  %3042 = vmatpush3.bf16.xpose.msra.mxu1 %v1742_v27 }
 0xca1   :  { %3037 = vmatprep.mubr.msk.bf16.mxu0 %vm3332_vm0, %v3331_v0  ;;  %3043 = vmatprep.mubr.msk.bf16.mxu1 %vm3332_vm0, %v3331_v0 }
 0xca2   :  { %3047 = vmatprep.subr.bf16.mxu0 %v3331_v0  ;;  %3053 = vmatprep.subr.bf16.mxu1 %v3331_v0 }
 0xca7   :  { %3038 = vmatmul.mubr.msk.bf16.vlgmr.msra.gmra.mxu0 %vm185_vm3, %v3645_v10  ;;  %3044 = vmatmul.mubr.msk.bf16.vlgmr.msra.gmra.mxu1 %vm185_vm3, %v3647_v11 }
 0xca8   :  { %3048 = vmatpush3.bf16.xpose.msra.mxu0 %v1791_v29  ;;  %3054 = vmatpush3.bf16.msra.mxu1 %v1943_v30 }
 0xca9   :  { %3049 = vmatprep.mubr.msk.bf16.mxu0 %vm3332_vm0, %v3331_v0  ;;  %3059 = vmatprep.subr.bf16.mxu0 %v3331_v0 }
 0xcaa   :  { %3055 = vmatprep.mubr.msk.bf16.mxu1 %vm3332_vm0, %v3331_v0  ;;  %3065 = vmatprep.subr.bf16.mxu1 %v3331_v0 }
 0xcaf   :  { %3050 = vmatmul.mubr.msk.bf16.vlgmr.msra.gmra.mxu0 %vm185_vm3, %v3653_v14 }
 0xcb0   :  { %3060 = vmatpush3.bf16.msra.mxu0 %v1991_v32  ;;  %3061 = vmatprep.mubr.msk.bf16.mxu0 %vm3332_vm0, %v3331_v0 }
 0xcb1   :  { %3071 = vmatprep.subr.bf16.mxu0 %v3331_v0 }
 0xcee   :  { %v1484_v33 = vpop.f32.mrf.mxu1 }
 0xcef   :  { %v1833_v36 = vmul.f32 0.35355338, %v1484_v33 }
 0xcf0   :  { %v3009_v39 = vpop.f32.mrf.mxu1 }
 0xcf1   :  { %v1841_v40 = vsel %vm185_vm3, %v1833_v36, -inf }
 0xcf2   :  { %1842 = vmax.xlane.f32.xlu1 %v1841_v40  ;;  %v1487_v43 = vpop.f32.mrf.mxu1 }
 0xcf4   :  { %v3010_v44 = vpop.f32.mrf.mxu1 }
 0xd57   :  { %v1533_v45 = vpop.f32.mrf.mxu0  ;;  %v1582_v46 = vpop.f32.mrf.mxu1 }
 0xd58   :  { %v1834_v47 = vmul.f32 0.35355338, %v1533_v45  ;;  %v1835_v50 = vmul.f32 0.35355338, %v1582_v46 }
 0xd59   :  { %v3015_v48 = vpop.f32.mrf.mxu0  ;;  %v3021_v49 = vpop.f32.mrf.mxu1 }
 0xd5a   :  { %v1844_v51 = vsel %vm185_vm3, %v1834_v47, -inf  ;;  %v1847_v54 = vsel %vm185_vm3, %v1835_v50, -inf }
 0xd5b   :  { %v1585_v42 = vpop.f32.mrf.mxu1  ;;  %1845 = vmax.xlane.f32.xlu0 %v1844_v51  ;;  %v1536_v52 = vpop.f32.mrf.mxu0 }
 0xd5d   :  { %v3016_v41 = vpop.f32.mrf.mxu0  ;;  %v3022_v53 = vpop.f32.mrf.mxu1 }
 0xd5f   :  { %v1680_v55 = vpop.f32.mrf.mxu1  ;;  %1848 = vmax.xlane.f32.xlu0 %v1847_v54  ;;  %v1631_v58 = vpop.f32.mrf.mxu0 }
 0xd60   :  { %v3712_v59 = vmul.f32 0.35355338, %v1680_v55  ;;  %v1836_v60 = vmul.f32 0.35355338, %v1631_v58 }
 0xd61   :  { %v3027_v62 = vpop.f32.mrf.mxu0  ;;  %v3033_v35 = vpop.f32.mrf.mxu1 }
 0xd62   :  { %v1853_v63 = vsel %vm185_vm3, %v3712_v59, -inf  ;;  %v1850_v34 = vsel %vm185_vm3, %v1836_v60, -inf }
 0xd63   :  { %v1683_v1 = vpop.f32.mrf.mxu1  ;;  %1854 = vmax.xlane.f32.xlu0 %v1853_v63  ;;  %1851 = vmax.xlane.f32.xlu1 %v1850_v34  ;;  %v1634_v31 = vpop.f32.mrf.mxu0 }
 0xd65   :  { %v3028_v2 = vpop.f32.mrf.mxu0  ;;  %v3034_v61 = vpop.f32.mrf.mxu1 }
 0xd67   :  { %v1729_v5 = vpop.f32.mrf.mxu0  ;;  %v1778_v6 = vpop.f32.mrf.mxu1 }
 0xd68   :  { %v1838_v4 = vmul.f32 0.35355338, %v1729_v5  ;;  %v1839_v9 = vmul.f32 0.35355338, %v1778_v6 }
 0xd69   :  { %v3039_v12 = vpop.f32.mrf.mxu0  ;;  %v3045_v13 = vpop.f32.mrf.mxu1 }
 0xd6a   :  { %v1859_v15 = vsel %vm185_vm3, %v1839_v9, -inf  ;;  %v1856_v16 = vsel %vm185_vm3, %v1838_v4, -inf }
 0xd6b   :  { %v1781_v19 = vpop.f32.mrf.mxu1  ;;  %1860 = vmax.xlane.f32.xlu0 %v1859_v15  ;;  %1857 = vmax.xlane.f32.xlu1 %v1856_v16  ;;  %v1732_v20 = vpop.f32.mrf.mxu0 }
 0xd6d   :  { %v3040_v21 = vpop.f32.mrf.mxu0  ;;  %v3046_v22 = vpop.f32.mrf.mxu1 }
 0xd6f   :  { %v1827_v24 = vpop.f32.mrf.mxu0 }
 0xd70   :  { %v1840_v25 = vmul.f32 0.35355338, %v1827_v24 }
 0xd71   :  { %v3051_v37 = vpop.f32.mrf.mxu0 }
 0xd72   :  { %v1862_v26 = vsel %vm185_vm3, %v1840_v25, -inf }
 0xd73   :  { %1863 = vmax.xlane.f32.xlu1 %v1862_v26  ;;  %v1830_v38 = vpop.f32.mrf.mxu0 }
 0xd75   :  { %v3052_v23 = vpop.f32.mrf.mxu0 }
 0xd7b   :  { %v1843_v17 = vpop.xlane.xlu1 %1842 }
 0xd7c   :  { %v1865_v27 = vsub.f32 %v1833_v36, %v1843_v17 }
 0xd7e   :  { %v1873_v28 = vmul.f32 1.442695, %v1865_v27 }
 0xd80   :  { %3221 = vpow2.f32 %v1873_v28 }
 0xd81   :  { %2081 = vrot.lane.b32.xlu0 %v3637_v7, %s3337_s23 }
 0xd84   :  { %2033 = vrot.lane.b32.xlu1 %v3632_v3, %s3337_s23 }
 0xd8d   :  { %v3222_v29 = vpop.eup %3221 }
 0xd8e   :  { %v1889_v30 = vsel %vm185_vm3, %v3222_v29, 0.0 }
 0xda0   :  { %1890 = vadd.xlane.f32.xlu0 %v1889_v30 }
 0xde4   :  { %v1846_v18 = vpop.xlane.xlu0 %1845 }
 0xde5   :  { %v1866_v32 = vsub.f32 %v1834_v47, %v1846_v18 }
 0xde7   :  { %v1875_v33 = vmul.f32 1.442695, %v1866_v32 }
 0xde8   :  { %v1849_v39 = vpop.xlane.xlu0 %1848 }
 0xde9   :  { %3223 = vpow2.f32 %v1875_v33  ;;  %v1867_v40 = vsub.f32 %v1835_v50, %v1849_v39 }
 0xdeb   :  { %v1877_v43 = vmul.f32 1.442695, %v1867_v40 }
 0xdec   :  { %v1852_v45 = vpop.xlane.xlu1 %1851  ;;  %v1855_v46 = vpop.xlane.xlu0 %1854 }
 0xded   :  { %3225 = vpow2.f32 %v1877_v43  ;;  %v1868_v47 = vsub.f32 %v1836_v60, %v1852_v45  ;;  %v1869_v49 = vsub.f32 %v3712_v59, %v1855_v46 }
 0xdef   :  { %v1879_v50 = vmul.f32 1.442695, %v1868_v47  ;;  %v1881_v41 = vmul.f32 1.442695, %v1869_v49 }
 0xdf1   :  { %3227 = vpow2.f32 %v1879_v50 }
 0xdf2   :  { %3229 = vpow2.f32 %v1881_v41 }
 0xdf4   :  { %v1858_v48 = vpop.xlane.xlu1 %1857  ;;  %v1861_v51 = vpop.xlane.xlu0 %1860 }
 0xdf5   :  { %v1870_v42 = vsub.f32 %v1838_v4, %v1858_v48  ;;  %v1871_v53 = vsub.f32 %v1839_v9, %v1861_v51 }
 0xdf6   :  { %v3224_v7 = vpop.eup %3223 }
 0xdf7   :  { %v1892_v44 = vsel %vm185_vm3, %v3224_v7, 0.0  ;;  %v1883_v54 = vmul.f32 1.442695, %v1870_v42 }
 0xdf8   :  { %1893 = vadd.xlane.f32.xlu1 %v1892_v44 }
 0xdf9   :  { %3231 = vpow2.f32 %v1883_v54 }
 0xdfa   :  { %v3726_v3 = vpop.eup %3225 }
 0xdfb   :  { %v1895_v36 = vsel %vm185_vm3, %v3726_v3, 0.0 }
 0xdfc   :  { %1896 = vadd.xlane.f32.xlu0 %v1895_v36  ;;  %v1864_v52 = vpop.xlane.xlu1 %1863 }
 0xdfd   :  { %v1872_v55 = vsub.f32 %v1840_v25, %v1864_v52 }
 0xdfe   :  { %v3228_v60 = vpop.eup %3227 }
 0xdff   :  { %v1887_v58 = vmul.f32 1.442695, %v1872_v55  ;;  %v3735_v59 = vpop.eup %3229  ;;  %v1898_v35 = vsel %vm185_vm3, %v3228_v60, 0.0 }
 0xe00   :  { %v1901_v1 = vsel %vm185_vm3, %v3735_v59, 0.0  ;;  %v2034_v9 = vpop.permute.xlu1 %2033 }
 0xe01   :  { %v2039_v13 = vsel %vm684_vm4, %v2034_v9, 0  ;;  %v2351_v9 = vld [vmem:[#allocation5 + $0x120] sm:$0xff] }
 0xe06   :  { %v3738_v63 = vpop.eup %3231 }
 0xe07   :  { %v1904_v31 = vsel %vm185_vm3, %v3738_v63, 0.0 }
 0xe09   :  { %2129 = vrot.lane.b32.xlu1 %v3639_v8, %s3337_s23  ;;  %v1885_v8 = vmul.f32 1.442695, %v1871_v53 }
 0xe0b   :  { %3233 = vpow2.f32 %v1885_v8 }
 0xe0c   :  { %3235 = vpow2.f32 %v1887_v58 }
 0xe12   :  { %2177 = vrot.lane.b32.xlu0 %v3645_v10, %s3337_s23  ;;  %v2082_v10 = vpop.permute.xlu0 %2081 }
 0xe13   :  { %v2087_v24 = vsel %vm684_vm4, %v2082_v10, 0 }
 0xe18   :  { %v3740_v34 = vpop.eup %3233 }
 0xe19   :  { %v3746_v2 = vpop.eup %3235  ;;  %v1907_v61 = vsel %vm185_vm3, %v3740_v34, 0.0 }
 0xe1a   :  { %v1910_v5 = vsel %vm185_vm3, %v3746_v2, 0.0 }
 0xe29   :  { %v1891_v62 = vpop.xlane.xlu0 %1890 }
 0xe2a   :  { %3237 = vrcp.f32 %v1891_v62 }
 0xe2d   :  { %1899 = vadd.xlane.f32.xlu1 %v1898_v35 }
 0xe31   :  { %1902 = vadd.xlane.f32.xlu0 %v1901_v1  ;;  %1905 = vadd.xlane.f32.xlu1 %v1904_v31  ;;  %v2353_v1 = vld [vmem:[#allocation5 + $0x130] sm:$0xff]  ;;  %v2354_v31 = vld [vmem:[#allocation5 + $0x138] sm:$0xff] }
 0xe35   :  { %1908 = vadd.xlane.f32.xlu0 %v1907_v61  ;;  %1911 = vadd.xlane.f32.xlu1 %v1910_v5 }
 0xe37   :  { %v3238_v6 = vpop.eup %3237 }
 0xe38   :  { %v1914_v4 = vmul.f32 %v3238_v6, %v3222_v29 }
 0xe3a   :  { %v1929_v12 = vpack.c.bf16 %v1914_v4, %v1914_v4 }
 0xe3c   :  { %3056 = vmatmul.mubr.msk.bf16.vlgmr.msra.gmra.mxu1 %vm185_vm3, %v1929_v12  ;;  %v2352_v12 = vld [vmem:[#allocation5 + $0x128] sm:$0xff] }
 0xe3d   :  { %3066 = vmatpush3.bf16.msra.mxu1 %v2039_v13  ;;  %3067 = vmatprep.mubr.msk.bf16.mxu1 %vm3332_vm0, %v3331_v0  ;;  %v2356_v13 = vpack.c.bf16 %v2352_v12, %v2351_v9  ;;  %v2513_v9 = vld [vmem:[#allocation5 + $0x1b0] sm:$0xff]  ;;  %v2514_v12 = vld [vmem:[#allocation5 + $0x1b8] sm:$0xff] }
 0xe3e   :  { %3077 = vmatprep.subr.bf16.mxu1 %v3331_v0 }
 0xe46   :  { %2225 = vrot.lane.b32.xlu1 %v3647_v11, %s3337_s23 }
 0xe4b   :  { %2273 = vrot.lane.b32.xlu0 %v3653_v14, %s3337_s23 }
 0xe81   :  { %v1894_v15 = vpop.xlane.xlu1 %1893 }
 0xe82   :  { %3239 = vrcp.f32 %v1894_v15 }
 0xe85   :  { %v1897_v16 = vpop.xlane.xlu0 %1896  ;;  %v2130_v37 = vpop.permute.xlu1 %2129 }
 0xe86   :  { %3241 = vrcp.f32 %v1897_v16  ;;  %v2135_v14 = vsel %vm684_vm4, %v2130_v37, 0 }
 0xe89   :  { %v2178_v26 = vpop.permute.xlu0 %2177 }
 0xe8a   :  { %v2183_v39 = vsel %vm684_vm4, %v2178_v26, 0 }
 0xe8f   :  { %v3240_v19 = vpop.eup %3239 }
 0xe90   :  { %v1916_v20 = vmul.f32 %v3240_v19, %v3224_v7 }
 0xe92   :  { %v1930_v21 = vpack.c.bf16 %v1916_v20, %v1916_v20 }
 0xe93   :  { %v3242_v22 = vpop.eup %3241 }
 0xe94   :  { %3062 = vmatmul.mubr.msk.bf16.vlgmr.msra.gmra.mxu0 %vm185_vm3, %v1930_v21  ;;  %v1918_v25 = vmul.f32 %v3242_v22, %v3726_v3 }
 0xe95   :  { %3072 = vmatpush3.bf16.msra.mxu0 %v2087_v24  ;;  %3073 = vmatprep.mubr.msk.bf16.mxu0 %vm3332_vm0, %v3331_v0 }
 0xe96   :  { %v1931_v11 = vpack.c.bf16 %v1918_v25, %v1918_v25  ;;  %3083 = vmatprep.subr.bf16.mxu0 %v3331_v0 }
 0xe98   :  { %3068 = vmatmul.mubr.msk.bf16.vlgmr.msra.gmra.mxu1 %vm185_vm3, %v1931_v11 }
 0xe99   :  { %3078 = vmatpush3.bf16.msra.mxu1 %v2135_v14  ;;  %3079 = vmatprep.mubr.msk.bf16.mxu1 %vm3332_vm0, %v3331_v0 }
 0xe9a   :  { %3089 = vmatprep.subr.bf16.mxu1 %v3331_v0 }
 0xeb6   :  { %v1900_v38 = vpop.xlane.xlu1 %1899 }
 0xeb7   :  { %3243 = vrcp.f32 %v1900_v38 }
 0xeba   :  { %v1903_v23 = vpop.xlane.xlu0 %1902  ;;  %v1906_v17 = vpop.xlane.xlu1 %1905 }
 0xebb   :  { %3245 = vrcp.f32 %v1903_v23 }
 0xebc   :  { %3247 = vrcp.f32 %v1906_v17 }
 0xebe   :  { %v1909_v27 = vpop.xlane.xlu0 %1908  ;;  %v1912_v28 = vpop.xlane.xlu1 %1911 }
 0xebf   :  { %3249 = vrcp.f32 %v1909_v27 }
 0xec0   :  { %3251 = vrcp.f32 %v1912_v28 }
 0xec2   :  { %v2226_v43 = vpop.permute.xlu1 %2225  ;;  %v2274_v45 = vpop.permute.xlu0 %2273 }
 0xec3   :  { %v2231_v36 = vsel %vm684_vm4, %v2226_v43, 0  ;;  %v2279_v49 = vsel %vm684_vm4, %v2274_v45, 0 }
 0xec4   :  { %v3244_v29 = vpop.eup %3243 }
 0xec5   :  { %v1920_v30 = vmul.f32 %v3244_v29, %v3228_v60 }
 0xec7   :  { %v1932_v18 = vpack.c.bf16 %v1920_v30, %v1920_v30 }
 0xec8   :  { %v3246_v32 = vpop.eup %3245 }
 0xec9   :  { %v3248_v33 = vpop.eup %3247  ;;  %3074 = vmatmul.mubr.msk.bf16.vlgmr.msra.gmra.mxu0 %vm185_vm3, %v1932_v18  ;;  %v1922_v40 = vmul.f32 %v3246_v32, %v3735_v59 }
 0xeca   :  { %3084 = vmatpush3.bf16.msra.mxu0 %v2183_v39  ;;  %3085 = vmatprep.mubr.msk.bf16.mxu0 %vm3332_vm0, %v3331_v0  ;;  %v1924_v44 = vmul.f32 %v3248_v33, %v3738_v63 }
 0xecb   :  { %v1933_v7 = vpack.c.bf16 %v1922_v40, %v1922_v40  ;;  %3095 = vmatprep.subr.bf16.mxu0 %v3331_v0 }
 0xecc   :  { %v3250_v3 = vpop.eup %3249  ;;  %v1934_v46 = vpack.c.bf16 %v1924_v44, %v1924_v44 }
 0xecd   :  { %3080 = vmatmul.mubr.msk.bf16.vlgmr.msra.gmra.mxu1 %vm185_vm3, %v1933_v7  ;;  %v1926_v47 = vmul.f32 %v3250_v3, %v3740_v34  ;;  %v3252_v48 = vpop.eup %3251 }
 0xece   :  { %3090 = vmatpush3.bf16.msra.mxu1 %v2231_v36  ;;  %3091 = vmatprep.mubr.msk.bf16.mxu1 %vm3332_vm0, %v3331_v0  ;;  %v1928_v51 = vmul.f32 %v3252_v48, %v3746_v2  ;;  %v2357_v2 = vpack.c.bf16 %v2354_v31, %v2353_v1 }
 0xecf   :  { %3101 = vmatprep.subr.bf16.mxu1 %v3331_v0  ;;  %v1935_v50 = vpack.c.bf16 %v1926_v47, %v1926_v47 }
 0xed0   :  { %v1936_v42 = vpack.c.bf16 %v1928_v51, %v1928_v51 }
 0xed1   :  { %3086 = vmatmul.mubr.msk.bf16.vlgmr.msra.gmra.mxu0 %vm185_vm3, %v1934_v46 }
 0xed2   :  { %3096 = vmatpush3.bf16.msra.mxu0 %v2279_v49  ;;  %3097 = vmatprep.mubr.msk.bf16.mxu0 %vm3332_vm0, %v3331_v0  ;;  %v2750_v49 = vld [vmem:[#allocation5 + $0x140] ss:$0 sm:$0xff] }
 0xed3   :  { %3109 = vmatprep.subr.bf16.mxu0 %v3331_v0 }
 0xed5   :  { %3092 = vmatmul.mubr.msk.bf16.vlgmr.msra.gmra.mxu1 %vm185_vm3, %v1935_v50 }
 0xed6   :  { %3105 = vmatprep.mubr.msk.bf16.mxu1 %vm3332_vm0, %v3331_v0  ;;  %3102 = vmatpush3.bf16.msra.mxu1 %v2357_v2  ;;  %v2451_v2 = vld [vmem:[#allocation5 + $0x168] sm:$0xff] }
 0xed7   :  { %3103 = vmatprep.subr.bf16.mxu1 %v3331_v0 }
 0xed9   :  { %3098 = vmatmul.mubr.msk.bf16.vlgmr.msra.gmra.mxu0 %vm185_vm3, %v1936_v42 }
 0xeda   :  { %3113 = vmatprep.mubr.msk.bf16.mxu0 %vm3332_vm0, %v3331_v0  ;;  %3104 = vmatpush3.bf16.msra.mxu1 %v2356_v13  ;;  %v2519_v13 = vpack.c.bf16 %v2514_v12, %v2513_v9  ;;  %v2631_v12 = vld [vmem:[#allocation5 + $0x1e0] sm:$0xff] }
 0xedb   :  { %3117 = vmatprep.subr.bf16.mxu1 %v3331_v0 }
 0xefc   :  { %v1979_v52 = vpop.f32.mrf.mxu1 }
 0xefe   :  { %v3057_v41 = vpop.f32.mrf.mxu1 }
 0xf00   :  { %v1982_v53 = vpop.f32.mrf.mxu1 }
 0xf02   :  { %v3058_v54 = vpop.f32.mrf.mxu1 }
 0xf54   :  { %v2027_v55 = vpop.f32.mrf.mxu0 }
 0xf56   :  { %v3063_v8 = vpop.f32.mrf.mxu0 }
 0xf58   :  { %v2030_v58 = vpop.f32.mrf.mxu0  ;;  %v2075_v10 = vpop.f32.mrf.mxu1 }
 0xf5a   :  { %v3064_v60 = vpop.f32.mrf.mxu0  ;;  %v3069_v62 = vpop.f32.mrf.mxu1 }
 0xf5c   :  { %v2078_v59 = vpop.f32.mrf.mxu1 }
 0xf5e   :  { %v3070_v35 = vpop.f32.mrf.mxu1 }
 0xf89   :  { %v2123_v63 = vpop.f32.mrf.mxu0 }
 0xf8b   :  { %v3075_v34 = vpop.f32.mrf.mxu0 }
 0xf8d   :  { %v2126_v61 = vpop.f32.mrf.mxu0  ;;  %v2171_v5 = vpop.f32.mrf.mxu1 }
 0xf8e   :  { %v2452_v61 = vld [vmem:[#allocation5 + $0x170] sm:$0xff] }
 0xf8f   :  { %v3076_v6 = vpop.f32.mrf.mxu0  ;;  %v3081_v4 = vpop.f32.mrf.mxu1 }
 0xf90   :  { %v2450_v6 = vld [vmem:[#allocation5 + $0x160] sm:$0xff] }
 0xf91   :  { %v2174_v15 = vpop.f32.mrf.mxu1  ;;  %v2219_v16 = vpop.f32.mrf.mxu0 }
 0xf92   :  { %v3166_v19 = vpack.i.bf16 %v2219_v16, %v2027_v55 }
 0xf93   :  { %v3082_v20 = vpop.f32.mrf.mxu1  ;;  %v3087_v21 = vpop.f32.mrf.mxu0 }
 0xf94   :  { %3167 = vrot.lane.b32.xlu1 %v3166_v19, %s3329_s13 }
 0xf95   :  { %v2222_v22 = vpop.f32.mrf.mxu0  ;;  %v2267_v24 = vpop.f32.mrf.mxu1 }
 0xf96   :  { %v3171_v25 = vpack.i.bf16 %v2267_v24, %v2075_v10 }
 0xf97   :  { %v3088_v37 = vpop.f32.mrf.mxu0  ;;  %v3093_v11 = vpop.f32.mrf.mxu1 }
 0xf98   :  { %3172 = vrot.lane.b32.xlu0 %v3171_v25, %s3338_s24  ;;  %v2752_v37 = vld [vmem:[#allocation5 + $0x148] ss:$0 sm:$0xff] }
 0xf99   :  { %v2270_v14 = vpop.f32.mrf.mxu1  ;;  %v2315_v26 = vpop.f32.mrf.mxu0 }
 0xf9a   :  { %v3176_v38 = vpack.i.bf16 %v2315_v26, %v2123_v63 }
 0xf9b   :  { %v3094_v23 = vpop.f32.mrf.mxu1  ;;  %v3099_v17 = vpop.f32.mrf.mxu0 }
 0xf9c   :  { %3177 = vrot.lane.b32.xlu1 %v3176_v38, %s3339_s25  ;;  %v2753_v38 = vld [vmem:[#allocation5 + $0x150] ss:$0 sm:$0xff] }
 0xf9d   :  { %v2318_v27 = vpop.f32.mrf.mxu0 }
 0xf9f   :  { %v3100_v28 = vpop.f32.mrf.mxu0 }
0x1006   :  { %v3168_v29 = vpop.permute.xlu1 %3167 }
0x1007   :  { %v3170_v18 = vunpack.i.h.bf16 %v3168_v29  ;;  %v3169_v32 = vunpack.i.l.bf16 %v3168_v29  ;;  %v2511_v29 = vld [vmem:[#allocation5 + $0x1a0] sm:$0xff] }
0x1009   :  { %v2348_v43 = vsel %vm185_vm3, %v2171_v5, %v3170_v18  ;;  %v2333_v7 = vsel %vm185_vm3, %v1979_v52, %v3169_v32  ;;  %v2449_v5 = vld [vmem:[#allocation5 + $0x158] sm:$0xff]  ;;  %v2509_v32 = vld [vmem:[#allocation5 + $0x190] sm:$0xff] }
0x100a   :  { %v3173_v30 = vpop.permute.xlu0 %3172  ;;  %v2454_v4 = vpack.c.bf16 %v2450_v6, %v2449_v5  ;;  %v2632_v5 = vld [vmem:[#allocation5 + $0x1e8] sm:$0xff]  ;;  %v2633_v6 = vld [vmem:[#allocation5 + $0x1f0] sm:$0xff] }
0x100b   :  { %v3175_v33 = vunpack.i.h.bf16 %v3173_v30  ;;  %v3174_v39 = vunpack.i.l.bf16 %v3173_v30  ;;  %v2512_v30 = vld [vmem:[#allocation5 + $0x1a8] sm:$0xff]  ;;  %v2636_v9 = vpack.c.bf16 %v2633_v6, %v2632_v5 }
0x100c   :  { %v2518_v18 = vpack.c.bf16 %v2512_v30, %v2511_v29 }
0x100d   :  { %v2334_v36 = vsel %vm52_vm1, %v2333_v7, %v3174_v39  ;;  %v2349_v45 = vsel %vm52_vm1, %v2348_v43, %v3175_v33  ;;  %v2510_v33 = vld [vmem:[#allocation5 + $0x198] sm:$0xff]  ;;  %v2508_v43 = vld [vmem:[#allocation5 + $0x188] sm:$0xff] }
0x100e   :  { %v3178_v40 = vpop.permute.xlu1 %3177  ;;  %v2517_v39 = vpack.c.bf16 %v2510_v33, %v2509_v32 }
0x100f   :  { %v3180_v44 = vunpack.i.h.bf16 %v3178_v40  ;;  %v3179_v3 = vunpack.i.l.bf16 %v3178_v40  ;;  %v2507_v40 = vld [vmem:[#allocation5 + $0x180] sm:$0xff] }
0x1010   :  { %v2516_v7 = vpack.c.bf16 %v2508_v43, %v2507_v40 }
0x1011   :  { %v2350_v46 = vsel %vm1078_vm5, %v2349_v45, %v3180_v44  ;;  %v2335_v47 = vsel %vm1078_vm5, %v2334_v36, %v3179_v3  ;;  %v2754_v44 = vld [vmem:[#allocation5 + $0x178] ss:$0 sm:$0xff] }
0x1012   :  { %v2355_v48 = vpack.c.bf16 %v2350_v46, %v2335_v47 }
0x1014   :  { %3106 = vmatmul.mubr.msk.bf16.vlgmr.msra.gmra.mxu1 %vm109_vm2, %v2355_v48 }
0x1015   :  { %3125 = vmatprep.mubr.msk.bf16.mxu1 %vm3332_vm0, %v3331_v0  ;;  %3118 = vmatpush3.bf16.msra.mxu1 %v2519_v13 }
0x1016   :  { %3119 = vmatprep.subr.bf16.mxu1 %v3331_v0 }
0x1019   :  { %3120 = vmatpush3.bf16.msra.mxu1 %v2518_v18 }
0x101a   :  { %3121 = vmatprep.subr.bf16.mxu1 %v3331_v0 }
0x101d   :  { %3122 = vmatpush3.bf16.msra.mxu1 %v2517_v39 }
0x101e   :  { %3123 = vmatprep.subr.bf16.mxu1 %v3331_v0 }
0x1021   :  { %3124 = vmatpush3.bf16.msra.mxu1 %v2516_v7 }
0x10d4   :  { %v2400_v50 = vpop.f32.mrf.mxu1 }
0x10d5   :  { %v2401_v51 = vadd.f32 %v2750_v49, %v2400_v50 }
0x10d6   :  { %v3107_v42 = vpop.f32.mrf.mxu1 }
0x10d7   :  { %v2407_v52 = vadd.f32 %v2401_v51, %v3616_v56  ;;  %v2756_v42 = vld [vmem:[#allocation5 + $0x1c0] ss:$0 sm:$0xff] }
0x10d8   :  { %v2403_v41 = vpop.f32.mrf.mxu1 }
0x10d9   :  { %v2404_v53 = vadd.f32 %v2750_v49, %v2403_v41  ;;  %v2411_v54 = vsel %vm109_vm2, %v2407_v52, 0.0 }
0x10da   :  { %2412 = vadd.xlane.f32.xlu0 %v2411_v54  ;;  %v3108_v55 = vpop.f32.mrf.mxu1 }
0x10db   :  { %v2408_v8 = vadd.f32 %v2404_v53, %v3618_v57  ;;  %v2455_v57 = vpack.c.bf16 %v2452_v61, %v2451_v2 }
0x10dd   :  { %v2414_v58 = vsel %vm109_vm2, %v2408_v8, 0.0  ;;  %3110 = vmatpush3.bf16.msra.mxu0 %v2455_v57 }
0x10de   :  { %2415 = vadd.xlane.f32.xlu1 %v2414_v58  ;;  %3111 = vmatprep.subr.bf16.mxu0 %v3331_v0 }
0x10e1   :  { %3112 = vmatpush3.bf16.msra.mxu0 %v2454_v4  ;;  %v2630_v4 = vld [vmem:[#allocation5 + $0x1d8] sm:$0xff] }
0x10e2   :  { %3129 = vmatprep.subr.bf16.mxu0 %v3331_v0  ;;  %v2635_v13 = vpack.c.bf16 %v2631_v12, %v2630_v4 }
0x1163   :  { %v2413_v10 = vpop.xlane.xlu0 %2412 }
0x1164   :  { %v2417_v60 = vmul.f32 0.03125, %v2413_v10 }
0x1166   :  { %v2419_v62 = vsub.f32 %v2407_v52, %v2417_v60 }
0x1167   :  { %v2416_v59 = vpop.xlane.xlu1 %2415 }
0x1168   :  { %v2418_v35 = vmul.f32 0.03125, %v2416_v59  ;;  %v2421_v63 = vmul.f32 %v2419_v62, %v2419_v62 }
0x116a   :  { %v2420_v34 = vsub.f32 %v2408_v8, %v2418_v35  ;;  %v2423_v56 = vsel %vm109_vm2, %v2421_v63, 0.0 }
0x116b   :  { %2424 = vadd.xlane.f32.xlu0 %v2423_v56 }
0x116c   :  { %v2422_v1 = vmul.f32 %v2420_v34, %v2420_v34 }
0x116e   :  { %v2426_v31 = vsel %vm109_vm2, %v2422_v1, 0.0 }
0x116f   :  { %2427 = vadd.xlane.f32.xlu0 %v2426_v31 }
0x11f4   :  { %v2425_v15 = vpop.xlane.xlu0 %2424 }
0x11f5   :  { %v2429_v16 = vmul.f32 0.03125, %v2425_v15 }
0x11f7   :  { %v2431_v19 = vadd.f32 1e-05, %v2429_v16 }
0x11f8   :  { %v2428_v20 = vpop.xlane.xlu0 %2427 }
0x11f9   :  { %3253 = vrsqrt.f32 %v2431_v19  ;;  %v2430_v21 = vmul.f32 0.03125, %v2428_v20 }
0x11fb   :  { %v2432_v22 = vadd.f32 1e-05, %v2430_v21 }
0x11fd   :  { %3255 = vrsqrt.f32 %v2432_v22 }
0x1206   :  { %v3254_v24 = vpop.eup %3253 }
0x1207   :  { %v2435_v25 = vmul.f32 %v3254_v24, %v2419_v62 }
0x1209   :  { %v2441_v26 = vmul.f32 %v2752_v37, %v2435_v25  ;;  %v2758_v25 = vld [vmem:[#allocation5 + $0x1c8] ss:$0 sm:$0xff] }
0x120a   :  { %v3256_v11 = vpop.eup %3255 }
0x120b   :  { %v2436_v14 = vmul.f32 %v3256_v11, %v2420_v34  ;;  %v2447_v17 = vadd.f32 %v2753_v38, %v2441_v26  ;;  %v2759_v11 = vld [vmem:[#allocation5 + $0x1d0] ss:$0 sm:$0xff] }
0x120d   :  { %v2442_v23 = vmul.f32 %v2752_v37, %v2436_v14 }
0x120f   :  { %v2448_v27 = vadd.f32 %v2753_v38, %v2442_v23 }
0x1211   :  { %v2453_v28 = vpack.c.bf16 %v2448_v27, %v2447_v17 }
0x1213   :  { %3114 = vmatmul.mubr.msk.bf16.vlgmr.msra.gmra.mxu0 %vm109_vm2, %v2453_v28 }
0x1214   :  { %3133 = vmatprep.mubr.msk.bf16.mxu0 %vm3332_vm0, %v3331_v0  ;;  %3130 = vmatpush3.bf16.msra.mxu0 %v2636_v9 }
0x1215   :  { %3131 = vmatprep.subr.bf16.mxu0 %v3331_v0 }
0x1218   :  { %3132 = vmatpush3.bf16.msra.mxu0 %v2635_v13 }
0x12d3   :  { %v2498_v3 = vpop.f32.mrf.mxu0 }
0x12d4   :  { %v2499_v45 = vadd.f32 %v2754_v44, %v2498_v3 }
0x12d5   :  { %v3115_v36 = vpop.f32.mrf.mxu0 }
0x12d6   :  { %v2505_v49 = vmax.f32 %v2499_v45, 0.0 }
0x12d7   :  { %v2501_v46 = vpop.f32.mrf.mxu0 }
0x12d8   :  { %v2502_v47 = vadd.f32 %v2754_v44, %v2501_v46 }
0x12d9   :  { %v3116_v48 = vpop.f32.mrf.mxu0 }
0x12da   :  { %v2506_v50 = vmax.f32 %v2502_v47, 0.0 }
0x12dc   :  { %v2515_v51 = vpack.c.bf16 %v2506_v50, %v2505_v49  ;;  %v2760_v49 = vld [vmem:[#allocation5 + $0x1f8] ss:$0 sm:$0xff] }
0x12de   :  { %3126 = vmatmul.mubr.msk.bf16.vlgmr.msra.gmra.mxu1 %vm1270_vm6, %v2515_v51 }
0x139e   :  { %v2562_v52 = vpop.f32.mrf.mxu1 }
0x139f   :  { %v2563_v41 = vadd.f32 %v2756_v42, %v2562_v52 }
0x13a0   :  { %v3127_v53 = vpop.f32.mrf.mxu1 }
0x13a1   :  { %v2569_v54 = vadd.f32 %v2563_v41, %v2447_v17 }
0x13a2   :  { %v2565_v55 = vpop.f32.mrf.mxu1 }
0x13a3   :  { %v2566_v8 = vadd.f32 %v2756_v42, %v2565_v55  ;;  %v2573_v58 = vsel %vm109_vm2, %v2569_v54, 0.0 }
0x13a4   :  { %2574 = vadd.xlane.f32.xlu1 %v2573_v58  ;;  %v3128_v10 = vpop.f32.mrf.mxu1 }
0x13a5   :  { %v2570_v60 = vadd.f32 %v2566_v8, %v2448_v27 }
0x13a7   :  { %v2576_v62 = vsel %vm109_vm2, %v2570_v60, 0.0 }
0x13a8   :  { %2577 = vadd.xlane.f32.xlu0 %v2576_v62 }
0x142d   :  { %v2575_v59 = vpop.xlane.xlu1 %2574 }
0x142e   :  { %v2579_v35 = vmul.f32 0.03125, %v2575_v59 }
0x1430   :  { %v2581_v63 = vsub.f32 %v2569_v54, %v2579_v35 }
0x1431   :  { %v2578_v34 = vpop.xlane.xlu0 %2577 }
0x1432   :  { %v2580_v56 = vmul.f32 0.03125, %v2578_v34  ;;  %v2583_v1 = vmul.f32 %v2581_v63, %v2581_v63 }
0x1434   :  { %v2582_v31 = vsub.f32 %v2570_v60, %v2580_v56  ;;  %v2585_v2 = vsel %vm109_vm2, %v2583_v1, 0.0 }
0x1435   :  { %2586 = vadd.xlane.f32.xlu1 %v2585_v2 }
0x1436   :  { %v2584_v61 = vmul.f32 %v2582_v31, %v2582_v31 }
0x1438   :  { %v2588_v57 = vsel %vm109_vm2, %v2584_v61, 0.0 }
0x1439   :  { %2589 = vadd.xlane.f32.xlu0 %v2588_v57 }
0x14be   :  { %v2587_v15 = vpop.xlane.xlu1 %2586 }
0x14bf   :  { %v2591_v16 = vmul.f32 0.03125, %v2587_v15 }
0x14c1   :  { %v2593_v19 = vadd.f32 1e-05, %v2591_v16 }
0x14c2   :  { %v2590_v20 = vpop.xlane.xlu0 %2589 }
0x14c3   :  { %3257 = vrsqrt.f32 %v2593_v19  ;;  %v2592_v21 = vmul.f32 0.03125, %v2590_v20 }
0x14c5   :  { %v2594_v22 = vadd.f32 1e-05, %v2592_v21 }
0x14c7   :  { %3259 = vrsqrt.f32 %v2594_v22 }
0x14d0   :  { %v3258_v24 = vpop.eup %3257 }
0x14d1   :  { %v2597_v37 = vmul.f32 %v3258_v24, %v2581_v63 }
0x14d3   :  { %v2603_v14 = vmul.f32 %v2758_v25, %v2597_v37 }
0x14d4   :  { %v3260_v26 = vpop.eup %3259 }
0x14d5   :  { %v2609_v38 = vadd.f32 %v2759_v11, %v2603_v14  ;;  %v2598_v23 = vmul.f32 %v3260_v26, %v2582_v31 }
0x14d7   :  { %v2611_v17 = vsel %vm109_vm2, %v2609_v38, 0.0  ;;  %v2604_v0 = vmul.f32 %v2758_v25, %v2598_v23 }
0x14d8   :  { %v2612_v27 = vrot.slane %v2611_v17, 4 }
0x14d9   :  { %v2610_v28 = vadd.f32 %v2759_v11, %v2604_v0 }
0x14da   :  { %v2613_v29 = vadd.f32 %v2612_v27, %v2611_v17 }
0x14db   :  { %v2620_v30 = vsel %vm109_vm2, %v2610_v28, 0.0 }
0x14dc   :  { %v2621_v18 = vrot.slane %v2620_v30, 4  ;;  %v2614_v32 = vrot.slane %v2613_v29, 2 }
0x14de   :  { %v2615_v33 = vadd.f32 %v2614_v32, %v2613_v29  ;;  %v2622_v39 = vadd.f32 %v2621_v18, %v2620_v30 }
0x14e0   :  { %v2616_v40 = vrot.slane %v2615_v33, 1  ;;  %v2623_v43 = vrot.slane %v2622_v39, 2 }
0x14e2   :  { %v2624_v7 = vadd.f32 %v2623_v43, %v2622_v39  ;;  %v2617_v44 = vadd.f32 %v2616_v40, %v2615_v33 }
0x14e4   :  { %v2625_v3 = vrot.slane %v2624_v7, 1  ;;  %v2619_v45 = vmul.f32 0.125, %v2617_v44 }
0x14e6   :  { %v2626_v36 = vadd.f32 %v2625_v3, %v2624_v7 }
0x14e8   :  { %v2627_v46 = vmul.f32 0.125, %v2626_v36 }
0x14ea   :  { %v2629_v47 = vsel %vm2628_vm7, %v2619_v45, %v2627_v46 }
0x14eb   :  { %v2634_v48 = vpack.c.bf16 %v2629_v47, %v2629_v47 }
0x14ed   :  { %3134 = vmatmul.mubr.msk.bf16.vlgmr.msra.gmra.mxu0 %vm109_vm2, %v2634_v48 }
0x15ad   :  { %v2679_v50 = vpop.f32.mrf.mxu0 }
0x15ae   :  { %v2680_v51 = vadd.f32 %v2760_v49, %v2679_v50 }
0x15af   :  { %v3135_v42 = vpop.f32.mrf.mxu0 }
0x15b0   :  { %2685 = vst [vmem:[#allocation7] sm:$0x3] %v2680_v51 }
0x15b1   :  { %v2682_v52 = vpop.f32.mrf.mxu0 }
0x15b2   :  { %3312 = shalt.err (!%p3309_p0)
}
0x15b3   :  { %2695 = dma.vmem_to_hbm [thread:$0]  %s2693_s27, 32, %s3839_s2, [#allocation4]   ;;  %v3136_v41 = vpop.f32.mrf.mxu0 }
0x15b4   :  { %3325 = dma.done.wait [#allocation4], 32  }
0x15b5   :  { %3326 = vsyncadd [#allocation4], 4294967264 }
0x15b6   :  { %2699 = vsyncpa [#allocation3], 1 }
0x15b7   :  { %2700 = vsyncpa [#allocation6], 1 }
0x15b8   :  { %2701 = vsyncpa [#allocation4], 1 }

</bundles_post_ra>
